<compile_context>
chip_gen: v7x
topology: tpu7x:2x2x1
jax: 0.10.0
libtpu: 0.0.40
codegen_flags: <defaults>
</compile_context>

<pallas_src>
import functools

import jax
import jax.numpy as jnp
from jax.experimental import pallas as pl
from jax.experimental.pallas import tpu as pltpu


def _round_up(x, m):
    return ((x + m - 1) // m) * m


def _clstm_kernel(x_ref, w_ref, b_ref, cprev_ref, h_ref, c_ref, *, GW):
    """One row-tile (TM rows of batch*H) per grid step.

    x_ref     : (TM, KH*Kp)    bf16  row-strip patches
    w_ref     : (KH*Kp, 4*GW)  bf16  block-Toeplitz conv weights
    b_ref     : (1, 4*GW)      f32   bias, column-ordered (gate, w, c)
    cprev_ref : (TM, GW)       f32   previous cell-state rows
    h_ref     : (TM, GW)       f32   new hidden-state rows
    c_ref     : (TM, GW)       f32   new cell-state rows
    """
    # Single MXU matmul: all KHxKW conv offsets live in the contraction dim.
    gates = jnp.dot(x_ref[...], w_ref[...],
                    preferred_element_type=jnp.float32)
    gates = gates + b_ref[...]                       # (TM, 4*GW) + (1, 4*GW)

    # Gate order matches torch .chunk(4, 1): in, remember, out, cell.
    # One EUP sweep over the first three gates; each slice below is a
    # 128-aligned, lane-dense (TM, GW) block (GW = W*Hc).
    sig = jax.nn.sigmoid(gates[:, 0:3 * GW])
    in_gate = sig[:, 0 * GW:1 * GW]
    remember_gate = sig[:, 1 * GW:2 * GW]
    out_gate = sig[:, 2 * GW:3 * GW]
    cell_gate = jnp.tanh(gates[:, 3 * GW:4 * GW])

    cell = remember_gate * cprev_ref[...] + in_gate * cell_gate
    h_ref[...] = out_gate * jnp.tanh(cell)           # unmasked, full-lane store
    c_ref[...] = cell


@functools.partial(jax.jit, static_argnums=(6, 7, 8))
def conv_lstm_cell_mask_forward(input_, prev_mask, prev_state_spatial,
                                hidden_state_temporal, weight, bias,
                                hidden_size, kernel_size, padding):
    """Forward pass of ConvLSTMCellMask.  All tensors NCHW float32 (PyTorch):
      input_                : (B, input_size, H, W)
      prev_mask             : (B, 1, H, W)
      prev_state_spatial    : None or (prev_hidden, prev_cell), each (B, hidden, H, W)
      hidden_state_temporal : None or (B, hidden, H, W)
      weight                : (4*hidden, input_size + 2*hidden + 1, KH, KW)  (OIHW)
      bias                  : (4*hidden,)
    Returns [hidden, cell], each (B, hidden, H, W).
    """
    B = input_.shape[0]
    H, W = input_.shape[2], input_.shape[3]
    Hc = hidden_size
    KH = KW = kernel_size

    if prev_state_spatial is None:
        z = jnp.zeros((B, Hc, H, W), dtype=input_.dtype)
        prev_state_spatial = (z, z)
    if hidden_state_temporal is None:
        hidden_state_temporal = jnp.zeros((B, Hc, H, W), dtype=input_.dtype)
    prev_hidden_spatial, prev_cell_spatial = prev_state_spatial

    # ---- channel stack (NCHW concat), go channels-last, zero-pad spatially.
    stacked = jnp.concatenate(
        [input_, prev_mask, prev_hidden_spatial, hidden_state_temporal], axis=1)
    stacked_nhwc = jnp.transpose(stacked, (0, 2, 3, 1)).astype(jnp.float32)
    Cin = stacked_nhwc.shape[-1]
    xpad = jnp.pad(stacked_nhwc,
                   ((0, 0), (padding, padding), (padding, padding), (0, 0)))
    Hp, Wp = H + 2 * padding, W + 2 * padding
    assert Hp == H + KH - 1 and Wp == W + KW - 1, "expects 'same'-style padding"

    # ---- sizes (lane-padded to multiples of 128 for the MXU / vregs).
    KL = Wp * Cin                       # one padded input row, flattened
    Kp = _round_up(KL, 128)             # lane-padded row width
    Ktot = KH * Kp                      # contraction dim of the fused matmul
    GW = W * Hc                         # lane-dense per-gate width
    NG = 4 * GW                         # all four gates

    # ---- row-strip LHS (built once in the wrapper; no in-kernel relayouts):
    #      X[b*H+h, kh*Kp + w_in*Cin + ci] = xpad[b, h+kh, w_in, ci]
    xrows = jnp.pad(xpad.reshape(B, Hp, KL), ((0, 0), (0, 0), (0, Kp - KL)))
    strips = jnp.concatenate([xrows[:, kh:kh + H, :] for kh in range(KH)],
                             axis=-1)                          # (B, H, Ktot)
    x_lhs = strips.reshape(B * H, Ktot).astype(jnp.bfloat16)   # bf16 MXU operand

    # ---- block-Toeplitz weights: one matmul covers all offsets and all w_out.
    # Wt[kh*Kp + w_in*Cin + ci, g*GW + w_out*Hc + c]
    #   = weight[g*Hc+c, ci, kh, w_in - w_out]   (zero outside the kernel band)
    w_hwio = jnp.transpose(weight, (2, 3, 1, 0)).astype(jnp.float32)  # (KH,KW,Cin,4Hc)
    w_split = w_hwio.reshape(KH, KW, Cin, 4, Hc)
    shift = jnp.stack(
        [jnp.pad(jnp.eye(W, dtype=jnp.float32), ((kw, Wp - W - kw), (0, 0)))
         for kw in range(KW)], axis=0)                                # (KW, Wp, W)
    wt = jnp.einsum('kpq,hkigc->hpigqc', shift, w_split)     # (KH,Wp,Cin,4,W,Hc)
    wt = wt.reshape(KH, KL, NG)
    wt = jnp.pad(wt, ((0, 0), (0, Kp - KL), (0, 0)))
    wt = wt.reshape(Ktot, NG).astype(jnp.bfloat16)           # bf16 MXU operand

    # Bias, column-ordered (gate, w, c); stays f32.
    b_cols = jnp.broadcast_to(bias.astype(jnp.float32).reshape(4, 1, Hc),
                              (4, W, Hc)).reshape(1, NG)

    # Previous cell state as lane-dense (B*H, W*Hc) rows, f32.
    cprev_rows = jnp.transpose(prev_cell_spatial, (0, 2, 3, 1)).reshape(
        B * H, GW).astype(jnp.float32)

    # ---- row tiling: fold batch into M, tile rows of (B*H).
    Mrows = B * H
    TM = 256 if Mrows >= 256 else _round_up(Mrows, 16)
    Mpad = _round_up(Mrows, TM)
    if Mpad != Mrows:
        x_lhs = jnp.pad(x_lhs, ((0, Mpad - Mrows), (0, 0)))
        cprev_rows = jnp.pad(cprev_rows, ((0, Mpad - Mrows), (0, 0)))
    grid = (Mpad // TM,)

    kernel = functools.partial(_clstm_kernel, GW=GW)

    cost = pl.CostEstimate(
        flops=2 * Mpad * Ktot * NG,
        transcendentals=5 * Mpad * GW,
        bytes_accessed=(x_lhs.size * 2 + wt.size * 2 + b_cols.size * 4
                        + cprev_rows.size * 4 + 2 * Mpad * GW * 4),
    )

    # VMEM budget: double-buffered x / cprev / outputs, resident weight+bias,
    # plus generous headroom for compiler scratch.  Safe on v5e/v6e/v7x.
    block_bytes = (2 * (TM * Ktot * 2)            # x tile (bf16), 2 buffers
                   + 2 * (Ktot * NG * 2)          # weight (bf16), 2 buffers
                   + 2 * (NG * 4)                 # bias (f32)
                   + 2 * (TM * GW * 4)            # cprev tile (f32)
                   + 2 * 2 * (TM * GW * 4))       # two output tiles (f32)
    vmem_limit = min(max(2 * block_bytes + (4 << 20), 16 << 20), 48 << 20)

    h_rows, c_rows = pl.pallas_call(
        kernel,
        out_shape=(
            jax.ShapeDtypeStruct((Mpad, GW), jnp.float32),
            jax.ShapeDtypeStruct((Mpad, GW), jnp.float32),
        ),
        grid=grid,
        in_specs=[
            pl.BlockSpec((TM, Ktot), lambda m: (m, 0)),
            pl.BlockSpec((Ktot, NG), lambda m: (0, 0)),   # constant block: weights stay resident
            pl.BlockSpec((1, NG), lambda m: (0, 0)),
            pl.BlockSpec((TM, GW), lambda m: (m, 0)),
        ],
        out_specs=(
            pl.BlockSpec((TM, GW), lambda m: (m, 0)),
            pl.BlockSpec((TM, GW), lambda m: (m, 0)),
        ),
        compiler_params=pltpu.CompilerParams(
            dimension_semantics=("parallel",),
            vmem_limit_bytes=vmem_limit,
        ),
        cost_estimate=cost,
    )(x_lhs, wt, b_cols, cprev_rows)

    h_nhwc = h_rows[:Mrows].reshape(B, H, W, Hc)
    c_nhwc = c_rows[:Mrows].reshape(B, H, W, Hc)
    hidden = jnp.transpose(h_nhwc, (0, 3, 1, 2))   # back to NCHW
    cell = jnp.transpose(c_nhwc, (0, 3, 1, 2))
    return [hidden, cell]


def _reference_forward(input_, prev_mask, prev_state_spatial,
                       hidden_state_temporal, weight, bias,
                       hidden_size, padding, matmul_dtype=jnp.float32):
    """Pure-JAX reference (mirrors the PyTorch module).  `matmul_dtype` lets us
    build a reference whose conv operands are quantized to bf16 exactly like
    the kernel's (gating/state math stays f32)."""
    prev_hidden, prev_cell = prev_state_spatial
    stacked = jnp.concatenate(
        [input_, prev_mask, prev_hidden, hidden_state_temporal], axis=1)
    gates = jax.lax.conv_general_dilated(
        stacked.astype(matmul_dtype), weight.astype(matmul_dtype),
        window_strides=(1, 1),
        padding=[(padding, padding), (padding, padding)],
        dimension_numbers=("NCHW", "OIHW", "NCHW"),
        preferred_element_type=jnp.float32)
    gates = gates + bias.reshape(1, -1, 1, 1).astype(jnp.float32)
    Hc = hidden_size
    in_g = jax.nn.sigmoid(gates[:, 0 * Hc:1 * Hc])
    rem_g = jax.nn.sigmoid(gates[:, 1 * Hc:2 * Hc])
    out_g = jax.nn.sigmoid(gates[:, 2 * Hc:3 * Hc])
    cell_g = jnp.tanh(gates[:, 3 * Hc:4 * Hc])
    cell = rem_g * prev_cell.astype(jnp.float32) + in_g * cell_g
    hidden = out_g * jnp.tanh(cell)
    return [hidden, cell]


if __name__ == "__main__":
    # Small shapes consistent with the module's forward pass.
    batch = 2
    input_size = 4
    hidden_size = 8
    kernel_size = 3
    padding = 1
    H = W = 16

    in_channels = input_size + 2 * hidden_size + 1   # 21
    out_channels = 4 * hidden_size                   # 32

    key = jax.random.PRNGKey(0)
    k_w, k_b, k_x, k_m, k_h, k_c, k_t = jax.random.split(key, 7)

    # Deterministic Conv2d-style init (uniform(-bound, bound), fan_in based).
    fan_in = in_channels * kernel_size * kernel_size
    bound = 1.0 / (fan_in ** 0.5)
    weight = jax.random.uniform(
        k_w, (out_channels, in_channels, kernel_size, kernel_size),
        minval=-bound, maxval=bound, dtype=jnp.float32)
    bias = jax.random.uniform(
        k_b, (out_channels,), minval=-bound, maxval=bound, dtype=jnp.float32)

    x = jax.random.normal(k_x, (batch, input_size, H, W), dtype=jnp.float32)
    prev_mask = jax.random.normal(k_m, (batch, 1, H, W), dtype=jnp.float32)
    prev_hidden = jax.random.normal(k_h, (batch, hidden_size, H, W),
                                    dtype=jnp.float32)
    prev_cell = jax.random.normal(k_c, (batch, hidden_size, H, W),
                                  dtype=jnp.float32)
    hidden_temporal = jax.random.normal(k_t, (batch, hidden_size, H, W),
                                        dtype=jnp.float32)

    hidden_out, cell_out = conv_lstm_cell_mask_forward(
        x, prev_mask, (prev_hidden, prev_cell), hidden_temporal,
        weight, bias, hidden_size, kernel_size, padding)
    jax.block_until_ready(hidden_out)
    jax.block_until_ready(cell_out)

    # Tight check vs a reference whose conv operands are quantized to bf16 the
    # same way the kernel's are: validates the Toeplitz/row-strip indexing,
    # gate ordering and gating math exactly.
    h_bf, c_bf = _reference_forward(
        x, prev_mask, (prev_hidden, prev_cell), hidden_temporal,
        weight, bias, hidden_size, padding, matmul_dtype=jnp.bfloat16)
    assert jnp.allclose(hidden_out, h_bf, atol=1e-3, rtol=1e-3)
    assert jnp.allclose(cell_out, c_bf, atol=1e-3, rtol=1e-3)

    # Looser check vs the exact f32 module semantics (difference comes only
    # from bf16 rounding of the MXU operands; accumulation/gating are f32).
    h_ref, c_ref = _reference_forward(
        x, prev_mask, (prev_hidden, prev_cell), hidden_temporal,
        weight, bias, hidden_size, padding, matmul_dtype=jnp.float32)
    assert jnp.allclose(hidden_out, h_ref, atol=5e-2, rtol=5e-2)
    assert jnp.allclose(cell_out, c_ref, atol=5e-2, rtol=5e-2)

    print("KERNEL_OK")
</pallas_src>

<mosaic_0001>
module attributes {stable_mosaic.version = 11 : i64} {
  func.func @_clstm_kernel(%arg0: i32, %arg1: memref<32x1152xbf16, #tpu.memory_space<vmem>>, %arg2: memref<1152x512xbf16, #tpu.memory_space<vmem>>, %arg3: memref<1x512xf32, #tpu.memory_space<vmem>>, %arg4: memref<32x128xf32, #tpu.memory_space<vmem>>, %arg5: memref<32x128xf32, #tpu.memory_space<vmem>>, %arg6: memref<32x128xf32, #tpu.memory_space<vmem>>) attributes {dimension_semantics = [#tpu.dimension_semantics<parallel>], iteration_bounds = array<i64: 1>, scalar_prefetch = 0 : i64, scratch_operands = 0 : i64, tpu.core_type = #tpu.core_type<tc>, window_params = [{transform_indices = @transform_0, window_bounds = array<i64: 32, 1152>}, {pipeline_mode = #tpu.pipeline_mode<synchronous>, transform_indices = @transform_1, window_bounds = array<i64: 1152, 512>}, {pipeline_mode = #tpu.pipeline_mode<synchronous>, transform_indices = @transform_2, window_bounds = array<i64: 1, 512>}, {transform_indices = @transform_3, window_bounds = array<i64: 32, 128>}, {transform_indices = @transform_4, window_bounds = array<i64: 32, 128>}, {transform_indices = @transform_5, window_bounds = array<i64: 32, 128>}]} {
    %c0 = arith.constant 0 : index
    %c0_0 = arith.constant 0 : index
    %0 = vector.load %arg1[%c0, %c0_0] : memref<32x1152xbf16, #tpu.memory_space<vmem>>, vector<32x1152xbf16>
    %c0_1 = arith.constant 0 : index
    %c0_2 = arith.constant 0 : index
    %1 = vector.load %arg2[%c0_1, %c0_2] : memref<1152x512xbf16, #tpu.memory_space<vmem>>, vector<1152x512xbf16>
    %cst = arith.constant dense<0.000000e+00> : vector<32x512xf32>
    %2 = tpu.matmul %0, %1, %cst {dimension_numbers = #tpu.dot_dimension_numbers<[1], [0], [0], [1], [0, 0, 1, 1], [], []>} : vector<32x1152xbf16>, vector<1152x512xbf16>, vector<32x512xf32> -> vector<32x512xf32>
    %c0_3 = arith.constant 0 : index
    %c0_4 = arith.constant 0 : index
    %3 = vector.load %arg3[%c0_3, %c0_4] : memref<1x512xf32, #tpu.memory_space<vmem>>, vector<1x512xf32>
    %4 = vector.broadcast %3 : vector<1x512xf32> to vector<32x512xf32>
    %5 = arith.addf %2, %4 : vector<32x512xf32>
    %6 = vector.extract_strided_slice %5 {offsets = [0, 0], sizes = [32, 384], strides = [1, 1]} : vector<32x512xf32> to vector<32x384xf32>
    %7 = arith.negf %6 : vector<32x384xf32>
    %8 = math.exp %7 : vector<32x384xf32>
    %cst_5 = arith.constant 1.000000e+00 : f32
    %9 = vector.broadcast %cst_5 : f32 to vector<32x384xf32>
    %10 = arith.addf %9, %8 : vector<32x384xf32>
    %11 = arith.divf %9, %10 : vector<32x384xf32>
    %12 = vector.extract_strided_slice %11 {offsets = [0, 0], sizes = [32, 128], strides = [1, 1]} : vector<32x384xf32> to vector<32x128xf32>
    %13 = vector.extract_strided_slice %11 {offsets = [0, 128], sizes = [32, 128], strides = [1, 1]} : vector<32x384xf32> to vector<32x128xf32>
    %14 = vector.extract_strided_slice %11 {offsets = [0, 256], sizes = [32, 128], strides = [1, 1]} : vector<32x384xf32> to vector<32x128xf32>
    %15 = vector.extract_strided_slice %5 {offsets = [0, 384], sizes = [32, 128], strides = [1, 1]} : vector<32x512xf32> to vector<32x128xf32>
    %16 = math.tanh %15 : vector<32x128xf32>
    %c0_6 = arith.constant 0 : index
    %c0_7 = arith.constant 0 : index
    %17 = vector.load %arg4[%c0_6, %c0_7] : memref<32x128xf32, #tpu.memory_space<vmem>>, vector<32x128xf32>
    %18 = arith.mulf %13, %17 : vector<32x128xf32>
    %19 = arith.mulf %12, %16 : vector<32x128xf32>
    %20 = arith.addf %18, %19 : vector<32x128xf32>
    %21 = math.tanh %20 : vector<32x128xf32>
    %22 = arith.mulf %14, %21 : vector<32x128xf32>
    %c0_8 = arith.constant 0 : index
    %c0_9 = arith.constant 0 : index
    %23 = vector.load %arg5[%c0_8, %c0_9] : memref<32x128xf32, #tpu.memory_space<vmem>>, vector<32x128xf32>
    tpu.vector_store %arg5[%c0_8, %c0_9], %22 {strides = array<i32>} : memref<32x128xf32, #tpu.memory_space<vmem>>, vector<32x128xf32>,
    %c0_10 = arith.constant 0 : index
    %c0_11 = arith.constant 0 : index
    %24 = vector.load %arg6[%c0_10, %c0_11] : memref<32x128xf32, #tpu.memory_space<vmem>>, vector<32x128xf32>
    tpu.vector_store %arg6[%c0_10, %c0_11], %20 {strides = array<i32>} : memref<32x128xf32, #tpu.memory_space<vmem>>, vector<32x128xf32>,
    return
  }
  func.func @transform_0(%arg0: i32) -> (i32, i32) {
    %c0_i32 = arith.constant 0 : i32
    %c0_i32_0 = arith.constant 0 : i32
    return %arg0, %c0_i32 : i32, i32
  }
  func.func @transform_1(%arg0: i32) -> (i32, i32) {
    %c0_i32 = arith.constant 0 : i32
    %c0_i32_0 = arith.constant 0 : i32
    %c0_i32_1 = arith.constant 0 : i32
    return %c0_i32, %c0_i32_0 : i32, i32
  }
  func.func @transform_2(%arg0: i32) -> (i32, i32) {
    %c0_i32 = arith.constant 0 : i32
    %c0_i32_0 = arith.constant 0 : i32
    %c0_i32_1 = arith.constant 0 : i32
    return %c0_i32, %c0_i32_0 : i32, i32
  }
  func.func @transform_3(%arg0: i32) -> (i32, i32) {
    %c0_i32 = arith.constant 0 : i32
    %c0_i32_0 = arith.constant 0 : i32
    return %arg0, %c0_i32 : i32, i32
  }
  func.func @transform_4(%arg0: i32) -> (i32, i32) {
    %c0_i32 = arith.constant 0 : i32
    %c0_i32_0 = arith.constant 0 : i32
    return %arg0, %c0_i32 : i32, i32
  }
  func.func @transform_5(%arg0: i32) -> (i32, i32) {
    %c0_i32 = arith.constant 0 : i32
    %c0_i32_0 = arith.constant 0 : i32
    return %arg0, %c0_i32 : i32, i32
  }
}

</mosaic_0001>

<bundles_post_ra>
// kernel: conv_lstm_cell_mask_forward.1
= control target key start
LH: loop header
LB: loop body
LE: loop exit
PB: predicated region body
PF: predicated region fallthrough
CT: control target
= control target key end

     0   :  { %s4443_s1 = inlined_call_operand.vmem [shape: bf16[1152,512], index: 1, kind: input, shape index: {}]   ;;  %s4444_s0 = inlined_call_operand.vmem [shape: bf16[32,1152], index: 0, kind: input, shape index: {}]   ;;  %s4445_s2 = inlined_call_operand.vmem [shape: f32[1,512], index: 2, kind: input, shape index: {}]   ;;  %s4446_s3 = inlined_call_operand.vmem [shape: f32[32,128], index: 3, kind: input, shape index: {}]   ;;  %s4447_s5 = inlined_call_operand.vmem [shape: f32[32,128], index: 5, kind: output, shape index: {1}]   ;;  %s4448_s4 = inlined_call_operand.vmem [shape: f32[32,128], index: 4, kind: output, shape index: {0}]  }
   0x1   :  { %v2927_v0 = vld [vmem:[%s4443_s1 + $0x4] ss:$16 sps:$4 sm:$0xff]   ;;  %v2929_v1 = vld [vmem:[%s4443_s1 + $0xc] ss:$16 sps:$4 sm:$0xff]   ;;  %v2931_v2 = vld [vmem:[%s4443_s1] ss:$16 sps:$4 sm:$0xff]  }
   0x2   :  { %1882 = vmatprep.subr.bf16.mxu0 %v2927_v0  ;;  %v2932_v3 = vld [vmem:[%s4443_s1 + $0x8] ss:$16 sps:$4 sm:$0xff]   ;;  %2147 = vmatprep.subr.bf16.mxu1 %v2929_v1  ;;  %v2933_v4 = vld [vmem:[%s4443_s1 + $0x24] ss:$16 sps:$4 sm:$0xff]   ;;  %v2935_v5 = vld [vmem:[%s4443_s1 + $0x2c] ss:$16 sps:$4 sm:$0xff]  }
   0x3   :  { %1883 = vmatpush1.bf16.msra.mxu0 %v2931_v2  ;;  %2148 = vmatpush1.bf16.msra.mxu1 %v2932_v3  ;;  %v2937_v6 = vld [vmem:[%s4443_s1 + $0x20] ss:$16 sps:$4 sm:$0xff]   ;;  %v2938_v7 = vld [vmem:[%s4443_s1 + $0x28] ss:$16 sps:$4 sm:$0xff]   ;;  %v2939_v8 = vld [vmem:[%s4443_s1 + $0x44] ss:$16 sps:$4 sm:$0xff]  }
   0x4   :  { %1884 = vmatprep.subr.bf16.mxu0 %v2933_v4  ;;  %2149 = vmatprep.subr.bf16.mxu1 %v2935_v5  ;;  %v2941_v9 = vld [vmem:[%s4443_s1 + $0x4c] ss:$16 sps:$4 sm:$0xff]   ;;  %v2943_v10 = vld [vmem:[%s4443_s1 + $0x40] ss:$16 sps:$4 sm:$0xff]   ;;  %v2944_v11 = vld [vmem:[%s4443_s1 + $0x48] ss:$16 sps:$4 sm:$0xff]  }
   0x5   :  { %v2945_v12 = vld [vmem:[%s4443_s1 + $0x64] ss:$16 sps:$4 sm:$0xff]   ;;  %v2947_v13 = vld [vmem:[%s4443_s1 + $0x6c] ss:$16 sps:$4 sm:$0xff]   ;;  %v2949_v14 = vld [vmem:[%s4443_s1 + $0x60] ss:$16 sps:$4 sm:$0xff]  }
   0x6   :  { %v2950_v15 = vld [vmem:[%s4443_s1 + $0x68] ss:$16 sps:$4 sm:$0xff]   ;;  %v2951_v16 = vld [vmem:[%s4443_s1 + $0x84] ss:$16 sps:$4 sm:$0xff]   ;;  %v2953_v17 = vld [vmem:[%s4443_s1 + $0x8c] ss:$16 sps:$4 sm:$0xff]  }
   0x7   :  { %1885 = vmatpush1.bf16.msra.mxu0 %v2937_v6  ;;  %2150 = vmatpush1.bf16.msra.mxu1 %v2938_v7  ;;  %v2955_v18 = vld [vmem:[%s4443_s1 + $0x80] ss:$16 sps:$4 sm:$0xff]   ;;  %v2956_v19 = vld [vmem:[%s4443_s1 + $0x88] ss:$16 sps:$4 sm:$0xff]   ;;  %v2957_v20 = vld [vmem:[%s4443_s1 + $0xa4] ss:$16 sps:$4 sm:$0xff]  }
   0x8   :  { %1886 = vmatprep.subr.bf16.mxu0 %v2939_v8  ;;  %2151 = vmatprep.subr.bf16.mxu1 %v2941_v9  ;;  %v2959_v21 = vld [vmem:[%s4443_s1 + $0xac] ss:$16 sps:$4 sm:$0xff]   ;;  %v2961_v22 = vld [vmem:[%s4443_s1 + $0xa0] ss:$16 sps:$4 sm:$0xff]   ;;  %v2962_v23 = vld [vmem:[%s4443_s1 + $0xa8] ss:$16 sps:$4 sm:$0xff]  }
   0x9   :  { %v2963_v24 = vld [vmem:[%s4443_s1 + $0xc4] ss:$16 sps:$4 sm:$0xff]   ;;  %v2965_v25 = vld [vmem:[%s4443_s1 + $0xcc] ss:$16 sps:$4 sm:$0xff]   ;;  %v2967_v26 = vld [vmem:[%s4443_s1 + $0xc0] ss:$16 sps:$4 sm:$0xff]  }
   0xa   :  { %v2968_v27 = vld [vmem:[%s4443_s1 + $0xc8] ss:$16 sps:$4 sm:$0xff]   ;;  %v2969_v28 = vld [vmem:[%s4443_s1 + $0xe4] ss:$16 sps:$4 sm:$0xff]   ;;  %v2971_v29 = vld [vmem:[%s4443_s1 + $0xec] ss:$16 sps:$4 sm:$0xff]  }
   0xb   :  { %1887 = vmatpush1.bf16.msra.mxu0 %v2943_v10  ;;  %2152 = vmatpush1.bf16.msra.mxu1 %v2944_v11  ;;  %v2973_v30 = vld [vmem:[%s4443_s1 + $0xe0] ss:$16 sps:$4 sm:$0xff]   ;;  %v2974_v31 = vld [vmem:[%s4443_s1 + $0xe8] ss:$16 sps:$4 sm:$0xff]   ;;  %v2975_v32 = vld [vmem:[%s4443_s1 + $0x104] ss:$16 sps:$4 sm:$0xff]  }
   0xc   :  { %1888 = vmatprep.subr.bf16.mxu0 %v2945_v12  ;;  %2153 = vmatprep.subr.bf16.mxu1 %v2947_v13  ;;  %v2977_v33 = vld [vmem:[%s4443_s1 + $0x10c] ss:$16 sps:$4 sm:$0xff]   ;;  %v2979_v34 = vld [vmem:[%s4443_s1 + $0x100] ss:$16 sps:$4 sm:$0xff]   ;;  %v2980_v35 = vld [vmem:[%s4443_s1 + $0x108] ss:$16 sps:$4 sm:$0xff]  }
   0xd   :  { %v2981_v36 = vld [vmem:[%s4443_s1 + $0x124] ss:$16 sps:$4 sm:$0xff]   ;;  %v2983_v37 = vld [vmem:[%s4443_s1 + $0x12c] ss:$16 sps:$4 sm:$0xff]   ;;  %v2985_v38 = vld [vmem:[%s4443_s1 + $0x120] ss:$16 sps:$4 sm:$0xff]  }
   0xe   :  { %v2986_v39 = vld [vmem:[%s4443_s1 + $0x128] ss:$16 sps:$4 sm:$0xff]   ;;  %v2987_v40 = vld [vmem:[%s4443_s1 + $0x144] ss:$16 sps:$4 sm:$0xff]   ;;  %v2989_v41 = vld [vmem:[%s4443_s1 + $0x14c] ss:$16 sps:$4 sm:$0xff]  }
   0xf   :  { %1889 = vmatpush1.bf16.msra.mxu0 %v2949_v14  ;;  %2154 = vmatpush1.bf16.msra.mxu1 %v2950_v15  ;;  %v2991_v42 = vld [vmem:[%s4443_s1 + $0x140] ss:$16 sps:$4 sm:$0xff]   ;;  %v2992_v43 = vld [vmem:[%s4443_s1 + $0x148] ss:$16 sps:$4 sm:$0xff]   ;;  %v2993_v44 = vld [vmem:[%s4443_s1 + $0x164] ss:$16 sps:$4 sm:$0xff]  }
  0x10   :  { %1890 = vmatprep.subr.bf16.mxu0 %v2951_v16  ;;  %2155 = vmatprep.subr.bf16.mxu1 %v2953_v17  ;;  %v2995_v45 = vld [vmem:[%s4443_s1 + $0x16c] ss:$16 sps:$4 sm:$0xff]   ;;  %v2997_v46 = vld [vmem:[%s4443_s1 + $0x160] ss:$16 sps:$4 sm:$0xff]   ;;  %v2998_v47 = vld [vmem:[%s4443_s1 + $0x168] ss:$16 sps:$4 sm:$0xff]  }
  0x11   :  { %v3025_v48 = vld [vmem:[%s4444_s0 + $0x4] ss:$36 sps:$4 sm:$0xff]   ;;  %v3001_v50 = vld [vmem:[%s4443_s1 + $0x18c] ss:$16 sps:$4 sm:$0xff]   ;;  %v3003_v51 = vld [vmem:[%s4443_s1 + $0x180] ss:$16 sps:$4 sm:$0xff]  }
  0x12   :  { %v2999_v49 = vld [vmem:[%s4443_s1 + $0x184] ss:$16 sps:$4 sm:$0xff]   ;;  %1914 = vmatprep.mubr.bf16.mxu0 %v3025_v48  ;;  %2179 = vmatprep.mubr.bf16.mxu1 %v3025_v48  ;;  %v3004_v52 = vld [vmem:[%s4443_s1 + $0x188] ss:$16 sps:$4 sm:$0xff]   ;;  %v3007_v54 = vld [vmem:[%s4443_s1 + $0x1ac] ss:$16 sps:$4 sm:$0xff]  }
  0x13   :  { %1891 = vmatpush1.bf16.msra.mxu0 %v2955_v18  ;;  %2156 = vmatpush1.bf16.msra.mxu1 %v2956_v19  ;;  %v3005_v53 = vld [vmem:[%s4443_s1 + $0x1a4] ss:$16 sps:$4 sm:$0xff]   ;;  %v3009_v55 = vld [vmem:[%s4443_s1 + $0x1a0] ss:$16 sps:$4 sm:$0xff]   ;;  %v3010_v56 = vld [vmem:[%s4443_s1 + $0x1a8] ss:$16 sps:$4 sm:$0xff]  }
  0x14   :  { %1892 = vmatprep.subr.bf16.mxu0 %v2957_v20  ;;  %2157 = vmatprep.subr.bf16.mxu1 %v2959_v21  ;;  %v3011_v57 = vld [vmem:[%s4443_s1 + $0x1c4] ss:$16 sps:$4 sm:$0xff]   ;;  %v3013_v58 = vld [vmem:[%s4443_s1 + $0x1cc] ss:$16 sps:$4 sm:$0xff]   ;;  %v3015_v59 = vld [vmem:[%s4443_s1 + $0x1c0] ss:$16 sps:$4 sm:$0xff]  }
  0x15   :  { %v3016_v60 = vld [vmem:[%s4443_s1 + $0x1c8] ss:$16 sps:$4 sm:$0xff]   ;;  %v3017_v61 = vld [vmem:[%s4443_s1 + $0x1e4] ss:$16 sps:$4 sm:$0xff]   ;;  %v3019_v62 = vld [vmem:[%s4443_s1 + $0x1ec] ss:$16 sps:$4 sm:$0xff]  }
  0x16   :  { %v3021_v63 = vld [vmem:[%s4443_s1 + $0x1e0] ss:$16 sps:$4 sm:$0xff]   ;;  %v3022_v0 = vld [vmem:[%s4443_s1 + $0x1e8] ss:$16 sps:$4 sm:$0xff]   ;;  %v3028_v1 = vld [vmem:[%s4443_s1 + $0x204] ss:$16 sps:$4 sm:$0xff]  }
  0x17   :  { %1893 = vmatpush1.bf16.msra.mxu0 %v2961_v22  ;;  %2158 = vmatpush1.bf16.msra.mxu1 %v2962_v23  ;;  %v3031_v2 = vld [vmem:[%s4443_s1 + $0x20c] ss:$16 sps:$4 sm:$0xff]   ;;  %v3023_v3 = vld [vmem:[%s4444_s0] ss:$36 sps:$4 sm:$0xff]   ;;  %v3029_v5 = vld [vmem:[%s4443_s1 + $0x208] ss:$16 sps:$4 sm:$0xff]  }
  0x18   :  { %1894 = vmatprep.subr.bf16.mxu0 %v2963_v24  ;;  %2159 = vmatprep.subr.bf16.mxu1 %v2965_v25  ;;  %v3026_v4 = vld [vmem:[%s4443_s1 + $0x200] ss:$16 sps:$4 sm:$0xff]   ;;  %v3034_v6 = vld [vmem:[%s4443_s1 + $0x224] ss:$16 sps:$4 sm:$0xff]   ;;  %v3037_v7 = vld [vmem:[%s4443_s1 + $0x22c] ss:$16 sps:$4 sm:$0xff]  }
  0x19   :  { %v3032_v8 = vld [vmem:[%s4443_s1 + $0x220] ss:$16 sps:$4 sm:$0xff]   ;;  %v3035_v9 = vld [vmem:[%s4443_s1 + $0x228] ss:$16 sps:$4 sm:$0xff]   ;;  %v3040_v10 = vld [vmem:[%s4443_s1 + $0x244] ss:$16 sps:$4 sm:$0xff]  }
  0x1a   :  { %v3043_v11 = vld [vmem:[%s4443_s1 + $0x24c] ss:$16 sps:$4 sm:$0xff]   ;;  %v3038_v12 = vld [vmem:[%s4443_s1 + $0x240] ss:$16 sps:$4 sm:$0xff]   ;;  %v3041_v13 = vld [vmem:[%s4443_s1 + $0x248] ss:$16 sps:$4 sm:$0xff]  }
  0x1b   :  { %1895 = vmatpush1.bf16.msra.mxu0 %v2967_v26  ;;  %2160 = vmatpush1.bf16.msra.mxu1 %v2968_v27  ;;  %v3046_v14 = vld [vmem:[%s4443_s1 + $0x264] ss:$16 sps:$4 sm:$0xff]   ;;  %v3049_v15 = vld [vmem:[%s4443_s1 + $0x26c] ss:$16 sps:$4 sm:$0xff]   ;;  %v3044_v16 = vld [vmem:[%s4443_s1 + $0x260] ss:$16 sps:$4 sm:$0xff]  }
  0x1c   :  { %1896 = vmatprep.subr.bf16.mxu0 %v2969_v28  ;;  %2161 = vmatprep.subr.bf16.mxu1 %v2971_v29  ;;  %v3047_v17 = vld [vmem:[%s4443_s1 + $0x268] ss:$16 sps:$4 sm:$0xff]   ;;  %v3052_v18 = vld [vmem:[%s4443_s1 + $0x284] ss:$16 sps:$4 sm:$0xff]   ;;  %v3055_v19 = vld [vmem:[%s4443_s1 + $0x28c] ss:$16 sps:$4 sm:$0xff]  }
  0x1d   :  { %v3050_v20 = vld [vmem:[%s4443_s1 + $0x280] ss:$16 sps:$4 sm:$0xff]   ;;  %v3053_v21 = vld [vmem:[%s4443_s1 + $0x288] ss:$16 sps:$4 sm:$0xff]   ;;  %v3058_v22 = vld [vmem:[%s4443_s1 + $0x2a4] ss:$16 sps:$4 sm:$0xff]  }
  0x1e   :  { %v3061_v23 = vld [vmem:[%s4443_s1 + $0x2ac] ss:$16 sps:$4 sm:$0xff]   ;;  %v3056_v25 = vld [vmem:[%s4443_s1 + $0x2a0] ss:$16 sps:$4 sm:$0xff]   ;;  %v3059_v26 = vld [vmem:[%s4443_s1 + $0x2a8] ss:$16 sps:$4 sm:$0xff]  }
  0x1f   :  { %1897 = vmatpush1.bf16.msra.mxu0 %v2973_v30  ;;  %2162 = vmatpush1.bf16.msra.mxu1 %v2974_v31  ;;  %v3110_v24 = vld [vmem:[%s4444_s0 + $0x4c] ss:$36 sps:$4 sm:$0xff]   ;;  %v3064_v27 = vld [vmem:[%s4443_s1 + $0x2c4] ss:$16 sps:$4 sm:$0xff]   ;;  %v3065_v31 = vld [vmem:[%s4443_s1 + $0x2c8] ss:$16 sps:$4 sm:$0xff]  }
  0x20   :  { %1898 = vmatprep.subr.bf16.mxu0 %v2975_v32  ;;  %2163 = vmatprep.subr.bf16.mxu1 %v2977_v33  ;;  %v3067_v28 = vld [vmem:[%s4443_s1 + $0x2cc] ss:$16 sps:$4 sm:$0xff]   ;;  %v3062_v30 = vld [vmem:[%s4443_s1 + $0x2c0] ss:$16 sps:$4 sm:$0xff]   ;;  %v3070_v32 = vld [vmem:[%s4443_s1 + $0x2e4] ss:$16 sps:$4 sm:$0xff]  }
  0x21   :  { %v3118_v29 = vld [vmem:[%s4444_s0 + $0x48] ss:$36 sps:$4 sm:$0xff]  }
  0x22   :  { %v3073_v33 = vld [vmem:[%s4443_s1 + $0x2ec] ss:$16 sps:$4 sm:$0xff]   ;;  %v3089_v48 = vld [vmem:[%s4443_s1 + $0x348] ss:$16 sps:$4 sm:$0xff]  }
  0x23   :  { %1899 = vmatpush1.bf16.msra.mxu0 %v2979_v34  ;;  %2164 = vmatpush1.bf16.msra.mxu1 %v2980_v35  ;;  %v3127_v34 = vld [vmem:[%s4444_s0 + $0xc] ss:$36 sps:$4 sm:$0xff]  }
  0x24   :  { %1900 = vmatprep.subr.bf16.mxu0 %v2981_v36  ;;  %2165 = vmatprep.subr.bf16.mxu1 %v2983_v37  ;;  %v3068_v35 = vld [vmem:[%s4443_s1 + $0x2e0] ss:$16 sps:$4 sm:$0xff]   ;;  %v3071_v36 = vld [vmem:[%s4443_s1 + $0x2e8] ss:$16 sps:$4 sm:$0xff]   ;;  %v3076_v37 = vld [vmem:[%s4443_s1 + $0x304] ss:$16 sps:$4 sm:$0xff]  }
  0x27   :  { %1901 = vmatpush1.bf16.msra.mxu0 %v2985_v38  ;;  %2166 = vmatpush1.bf16.msra.mxu1 %v2986_v39  ;;  %v3079_v38 = vld [vmem:[%s4443_s1 + $0x30c] ss:$16 sps:$4 sm:$0xff]   ;;  %v3074_v39 = vld [vmem:[%s4443_s1 + $0x300] ss:$16 sps:$4 sm:$0xff]  }
  0x28   :  { %1902 = vmatprep.subr.bf16.mxu0 %v2987_v40  ;;  %2167 = vmatprep.subr.bf16.mxu1 %v2989_v41  ;;  %v3077_v40 = vld [vmem:[%s4443_s1 + $0x308] ss:$16 sps:$4 sm:$0xff]   ;;  %v3082_v41 = vld [vmem:[%s4443_s1 + $0x324] ss:$16 sps:$4 sm:$0xff]  }
  0x2b   :  { %1903 = vmatpush1.bf16.msra.mxu0 %v2991_v42  ;;  %2168 = vmatpush1.bf16.msra.mxu1 %v2992_v43  ;;  %v3085_v42 = vld [vmem:[%s4443_s1 + $0x32c] ss:$16 sps:$4 sm:$0xff]   ;;  %v3080_v43 = vld [vmem:[%s4443_s1 + $0x320] ss:$16 sps:$4 sm:$0xff]  }
  0x2c   :  { %1904 = vmatprep.subr.bf16.mxu0 %v2993_v44  ;;  %2169 = vmatprep.subr.bf16.mxu1 %v2995_v45  ;;  %v3083_v44 = vld [vmem:[%s4443_s1 + $0x328] ss:$16 sps:$4 sm:$0xff]   ;;  %v3088_v45 = vld [vmem:[%s4443_s1 + $0x344] ss:$16 sps:$4 sm:$0xff]  }
  0x2f   :  { %1905 = vmatpush1.bf16.msra.mxu0 %v2997_v46  ;;  %2170 = vmatpush1.bf16.msra.mxu1 %v2998_v47  ;;  %v3091_v46 = vld [vmem:[%s4443_s1 + $0x34c] ss:$16 sps:$4 sm:$0xff]   ;;  %v3086_v47 = vld [vmem:[%s4443_s1 + $0x340] ss:$16 sps:$4 sm:$0xff]  }
  0x30   :  { %1906 = vmatprep.subr.bf16.mxu0 %v2999_v49  ;;  %2171 = vmatprep.subr.bf16.mxu1 %v3001_v50  ;;  %v3094_v49 = vld [vmem:[%s4443_s1 + $0x364] ss:$16 sps:$4 sm:$0xff]   ;;  %v3097_v50 = vld [vmem:[%s4443_s1 + $0x36c] ss:$16 sps:$4 sm:$0xff]  }
  0x33   :  { %1907 = vmatpush1.bf16.msra.mxu0 %v3003_v51  ;;  %2172 = vmatpush1.bf16.msra.mxu1 %v3004_v52  ;;  %v3092_v51 = vld [vmem:[%s4443_s1 + $0x360] ss:$16 sps:$4 sm:$0xff]   ;;  %v3095_v52 = vld [vmem:[%s4443_s1 + $0x368] ss:$16 sps:$4 sm:$0xff]  }
  0x34   :  { %1908 = vmatprep.subr.bf16.mxu0 %v3005_v53  ;;  %2173 = vmatprep.subr.bf16.mxu1 %v3007_v54  ;;  %v3100_v53 = vld [vmem:[%s4443_s1 + $0x384] ss:$16 sps:$4 sm:$0xff]   ;;  %v3103_v54 = vld [vmem:[%s4443_s1 + $0x38c] ss:$16 sps:$4 sm:$0xff]  }
  0x37   :  { %1909 = vmatpush1.bf16.msra.mxu0 %v3009_v55  ;;  %2174 = vmatpush1.bf16.msra.mxu1 %v3010_v56  ;;  %v3098_v55 = vld [vmem:[%s4443_s1 + $0x380] ss:$16 sps:$4 sm:$0xff]   ;;  %v3101_v56 = vld [vmem:[%s4443_s1 + $0x388] ss:$16 sps:$4 sm:$0xff]  }
  0x38   :  { %1910 = vmatprep.subr.bf16.mxu0 %v3011_v57  ;;  %2175 = vmatprep.subr.bf16.mxu1 %v3013_v58  ;;  %v3106_v57 = vld [vmem:[%s4443_s1 + $0x3a4] ss:$16 sps:$4 sm:$0xff]   ;;  %v3109_v58 = vld [vmem:[%s4443_s1 + $0x3ac] ss:$16 sps:$4 sm:$0xff]  }
  0x3b   :  { %1911 = vmatpush1.bf16.msra.mxu0 %v3015_v59  ;;  %2176 = vmatpush1.bf16.msra.mxu1 %v3016_v60  ;;  %v3104_v59 = vld [vmem:[%s4443_s1 + $0x3a0] ss:$16 sps:$4 sm:$0xff]   ;;  %v3107_v60 = vld [vmem:[%s4443_s1 + $0x3a8] ss:$16 sps:$4 sm:$0xff]  }
  0x3c   :  { %1912 = vmatprep.subr.bf16.mxu0 %v3017_v61  ;;  %2177 = vmatprep.subr.bf16.mxu1 %v3019_v62  ;;  %v3114_v61 = vld [vmem:[%s4443_s1 + $0x3c4] ss:$16 sps:$4 sm:$0xff]   ;;  %v3117_v62 = vld [vmem:[%s4443_s1 + $0x3cc] ss:$16 sps:$4 sm:$0xff]  }
  0x3f   :  { %1913 = vmatpush1.bf16.msra.mxu0 %v3021_v63  ;;  %2178 = vmatpush1.bf16.msra.mxu1 %v3022_v0  ;;  %v3112_v63 = vld [vmem:[%s4443_s1 + $0x3c0] ss:$16 sps:$4 sm:$0xff]   ;;  %v3115_v0 = vld [vmem:[%s4443_s1 + $0x3c8] ss:$16 sps:$4 sm:$0xff]  }
  0x40   :  { %1935 = vmatprep.subr.bf16.mxu0 %v3028_v1  ;;  %2200 = vmatprep.subr.bf16.mxu1 %v3031_v2  ;;  %v3121_v1 = vld [vmem:[%s4443_s1 + $0x3e4] ss:$16 sps:$4 sm:$0xff]   ;;  %v3124_v2 = vld [vmem:[%s4443_s1 + $0x3ec] ss:$16 sps:$4 sm:$0xff]  }
  0x42   :  { %1915 = vmatmul.mubr.bf16.vlgmr.msra.gmra.mrb[0].mxu0 %v3023_v3  ;;  %2180 = vmatmul.mubr.bf16.vlgmr.msra.gmra.mrb[0].mxu1 %v3023_v3  ;;  %v3119_v3 = vld [vmem:[%s4443_s1 + $0x3e0] ss:$16 sps:$4 sm:$0xff]  }
  0x43   :  { %1936 = vmatpush1.bf16.msra.mxu0 %v3026_v4  ;;  %2201 = vmatpush1.bf16.msra.mxu1 %v3029_v5  ;;  %v3122_v4 = vld [vmem:[%s4443_s1 + $0x3e8] ss:$16 sps:$4 sm:$0xff]   ;;  %v3130_v5 = vld [vmem:[%s4443_s1 + $0x404] ss:$16 sps:$4 sm:$0xff]  }
  0x44   :  { %1937 = vmatprep.subr.bf16.mxu0 %v3034_v6  ;;  %2202 = vmatprep.subr.bf16.mxu1 %v3037_v7  ;;  %v3133_v6 = vld [vmem:[%s4443_s1 + $0x40c] ss:$16 sps:$4 sm:$0xff]  }
  0x45   :  { %1924 = vmatprep.mubr.bf16.mxu0 %v3110_v24  ;;  %2189 = vmatprep.mubr.bf16.mxu1 %v3110_v24  ;;  %v3125_v7 = vld [vmem:[%s4444_s0 + $0x8] ss:$36 sps:$4 sm:$0xff]  }
  0x46   :  { %v3149_v24 = vld [vmem:[%s4443_s1 + $0x468] ss:$16 sps:$4 sm:$0xff]  }
  0x47   :  { %1938 = vmatpush1.bf16.msra.mxu0 %v3032_v8  ;;  %2203 = vmatpush1.bf16.msra.mxu1 %v3035_v9  ;;  %v3128_v8 = vld [vmem:[%s4443_s1 + $0x400] ss:$16 sps:$4 sm:$0xff]   ;;  %v3131_v9 = vld [vmem:[%s4443_s1 + $0x408] ss:$16 sps:$4 sm:$0xff]  }
  0x48   :  { %1939 = vmatprep.subr.bf16.mxu0 %v3040_v10  ;;  %2204 = vmatprep.subr.bf16.mxu1 %v3043_v11  ;;  %v3136_v10 = vld [vmem:[%s4443_s1 + $0x424] ss:$16 sps:$4 sm:$0xff]   ;;  %v3139_v11 = vld [vmem:[%s4443_s1 + $0x42c] ss:$16 sps:$4 sm:$0xff]  }
  0x4a   :  { %1925 = vmatmul.mubr.bf16.gmra.mrb[4].mxu0 %v3118_v29  ;;  %2190 = vmatmul.mubr.bf16.gmra.mrb[4].mxu1 %v3118_v29  ;;  %v3160_v29 = vld [vmem:[%s4443_s1 + $0x4a4] ss:$16 sps:$4 sm:$0xff]  }
  0x4b   :  { %1940 = vmatpush1.bf16.msra.mxu0 %v3038_v12  ;;  %2205 = vmatpush1.bf16.msra.mxu1 %v3041_v13  ;;  %v3212_v12 = vld [vmem:[%s4444_s0 + $0x54] ss:$36 sps:$4 sm:$0xff]   ;;  %v3134_v13 = vld [vmem:[%s4443_s1 + $0x420] ss:$16 sps:$4 sm:$0xff]  }
  0x4c   :  { %1941 = vmatprep.subr.bf16.mxu0 %v3046_v14  ;;  %2206 = vmatprep.subr.bf16.mxu1 %v3049_v15  ;;  %v3137_v14 = vld [vmem:[%s4443_s1 + $0x428] ss:$16 sps:$4 sm:$0xff]   ;;  %v3142_v15 = vld [vmem:[%s4443_s1 + $0x444] ss:$16 sps:$4 sm:$0xff]  }
  0x4d   :  { %1967 = vmatprep.mubr.bf16.mxu0 %v3127_v34  ;;  %2232 = vmatprep.mubr.bf16.mxu1 %v3127_v34  ;;  %v3169_v34 = vld [vmem:[%s4443_s1 + $0x4cc] ss:$16 sps:$4 sm:$0xff]  }
  0x4f   :  { %1942 = vmatpush1.bf16.msra.mxu0 %v3044_v16  ;;  %2207 = vmatpush1.bf16.msra.mxu1 %v3047_v17  ;;  %v3145_v16 = vld [vmem:[%s4443_s1 + $0x44c] ss:$16 sps:$4 sm:$0xff]   ;;  %v3140_v17 = vld [vmem:[%s4443_s1 + $0x440] ss:$16 sps:$4 sm:$0xff]  }
  0x50   :  { %1943 = vmatprep.subr.bf16.mxu0 %v3052_v18  ;;  %2208 = vmatprep.subr.bf16.mxu1 %v3055_v19  ;;  %v3143_v18 = vld [vmem:[%s4443_s1 + $0x448] ss:$16 sps:$4 sm:$0xff]   ;;  %v3220_v19 = vld [vmem:[%s4444_s0 + $0x50] ss:$36 sps:$4 sm:$0xff]  }
  0x53   :  { %1944 = vmatpush1.bf16.msra.mxu0 %v3050_v20  ;;  %2209 = vmatpush1.bf16.msra.mxu1 %v3053_v21  ;;  %v3148_v20 = vld [vmem:[%s4443_s1 + $0x464] ss:$16 sps:$4 sm:$0xff]   ;;  %v3151_v21 = vld [vmem:[%s4443_s1 + $0x46c] ss:$16 sps:$4 sm:$0xff]  }
  0x54   :  { %1945 = vmatprep.subr.bf16.mxu0 %v3058_v22  ;;  %2210 = vmatprep.subr.bf16.mxu1 %v3061_v23  ;;  %v3229_v22 = vld [vmem:[%s4444_s0 + $0x14] ss:$36 sps:$4 sm:$0xff]   ;;  %v3146_v23 = vld [vmem:[%s4443_s1 + $0x460] ss:$16 sps:$4 sm:$0xff]  }
  0x57   :  { %1946 = vmatpush1.bf16.msra.mxu0 %v3056_v25  ;;  %2211 = vmatpush1.bf16.msra.mxu1 %v3059_v26  ;;  %v3154_v25 = vld [vmem:[%s4443_s1 + $0x484] ss:$16 sps:$4 sm:$0xff]   ;;  %v3157_v26 = vld [vmem:[%s4443_s1 + $0x48c] ss:$16 sps:$4 sm:$0xff]  }
  0x58   :  { %1947 = vmatprep.subr.bf16.mxu0 %v3064_v27  ;;  %2212 = vmatprep.subr.bf16.mxu1 %v3067_v28  ;;  %v3152_v27 = vld [vmem:[%s4443_s1 + $0x480] ss:$16 sps:$4 sm:$0xff]   ;;  %v3155_v28 = vld [vmem:[%s4443_s1 + $0x488] ss:$16 sps:$4 sm:$0xff]  }
  0x5b   :  { %1948 = vmatpush1.bf16.msra.mxu0 %v3062_v30  ;;  %2213 = vmatpush1.bf16.msra.mxu1 %v3065_v31  ;;  %v3163_v30 = vld [vmem:[%s4443_s1 + $0x4ac] ss:$16 sps:$4 sm:$0xff]   ;;  %v3158_v31 = vld [vmem:[%s4443_s1 + $0x4a0] ss:$16 sps:$4 sm:$0xff]  }
  0x5c   :  { %1949 = vmatprep.subr.bf16.mxu0 %v3070_v32  ;;  %2214 = vmatprep.subr.bf16.mxu1 %v3073_v33  ;;  %v3161_v32 = vld [vmem:[%s4443_s1 + $0x4a8] ss:$16 sps:$4 sm:$0xff]   ;;  %v3166_v33 = vld [vmem:[%s4443_s1 + $0x4c4] ss:$16 sps:$4 sm:$0xff]  }
  0x5f   :  { %1950 = vmatpush1.bf16.msra.mxu0 %v3068_v35  ;;  %2215 = vmatpush1.bf16.msra.mxu1 %v3071_v36  ;;  %v3164_v35 = vld [vmem:[%s4443_s1 + $0x4c0] ss:$16 sps:$4 sm:$0xff]   ;;  %v3167_v36 = vld [vmem:[%s4443_s1 + $0x4c8] ss:$16 sps:$4 sm:$0xff]  }
  0x60   :  { %1951 = vmatprep.subr.bf16.mxu0 %v3076_v37  ;;  %2216 = vmatprep.subr.bf16.mxu1 %v3079_v38  ;;  %v3172_v37 = vld [vmem:[%s4443_s1 + $0x4e4] ss:$16 sps:$4 sm:$0xff]   ;;  %v3175_v38 = vld [vmem:[%s4443_s1 + $0x4ec] ss:$16 sps:$4 sm:$0xff]  }
  0x63   :  { %1952 = vmatpush1.bf16.msra.mxu0 %v3074_v39  ;;  %2217 = vmatpush1.bf16.msra.mxu1 %v3077_v40  ;;  %v3170_v39 = vld [vmem:[%s4443_s1 + $0x4e0] ss:$16 sps:$4 sm:$0xff]   ;;  %v3173_v40 = vld [vmem:[%s4443_s1 + $0x4e8] ss:$16 sps:$4 sm:$0xff]  }
  0x64   :  { %1953 = vmatprep.subr.bf16.mxu0 %v3082_v41  ;;  %2218 = vmatprep.subr.bf16.mxu1 %v3085_v42  ;;  %v3178_v41 = vld [vmem:[%s4443_s1 + $0x504] ss:$16 sps:$4 sm:$0xff]   ;;  %v3181_v42 = vld [vmem:[%s4443_s1 + $0x50c] ss:$16 sps:$4 sm:$0xff]  }
  0x67   :  { %1954 = vmatpush1.bf16.msra.mxu0 %v3080_v43  ;;  %2219 = vmatpush1.bf16.msra.mxu1 %v3083_v44  ;;  %v3176_v43 = vld [vmem:[%s4443_s1 + $0x500] ss:$16 sps:$4 sm:$0xff]   ;;  %v3179_v44 = vld [vmem:[%s4443_s1 + $0x508] ss:$16 sps:$4 sm:$0xff]  }
  0x68   :  { %1955 = vmatprep.subr.bf16.mxu0 %v3088_v45  ;;  %2220 = vmatprep.subr.bf16.mxu1 %v3091_v46  ;;  %v3184_v45 = vld [vmem:[%s4443_s1 + $0x524] ss:$16 sps:$4 sm:$0xff]   ;;  %v3187_v46 = vld [vmem:[%s4443_s1 + $0x52c] ss:$16 sps:$4 sm:$0xff]  }
  0x6b   :  { %1956 = vmatpush1.bf16.msra.mxu0 %v3086_v47  ;;  %2221 = vmatpush1.bf16.msra.mxu1 %v3089_v48  ;;  %v3182_v47 = vld [vmem:[%s4443_s1 + $0x520] ss:$16 sps:$4 sm:$0xff]   ;;  %v3185_v48 = vld [vmem:[%s4443_s1 + $0x528] ss:$16 sps:$4 sm:$0xff]  }
  0x6c   :  { %1957 = vmatprep.subr.bf16.mxu0 %v3094_v49  ;;  %2222 = vmatprep.subr.bf16.mxu1 %v3097_v50  ;;  %v3190_v49 = vld [vmem:[%s4443_s1 + $0x544] ss:$16 sps:$4 sm:$0xff]   ;;  %v3193_v50 = vld [vmem:[%s4443_s1 + $0x54c] ss:$16 sps:$4 sm:$0xff]  }
  0x6f   :  { %1958 = vmatpush1.bf16.msra.mxu0 %v3092_v51  ;;  %2223 = vmatpush1.bf16.msra.mxu1 %v3095_v52  ;;  %v3188_v51 = vld [vmem:[%s4443_s1 + $0x540] ss:$16 sps:$4 sm:$0xff]   ;;  %v3191_v52 = vld [vmem:[%s4443_s1 + $0x548] ss:$16 sps:$4 sm:$0xff]  }
  0x70   :  { %1959 = vmatprep.subr.bf16.mxu0 %v3100_v53  ;;  %2224 = vmatprep.subr.bf16.mxu1 %v3103_v54  ;;  %v3196_v53 = vld [vmem:[%s4443_s1 + $0x564] ss:$16 sps:$4 sm:$0xff]   ;;  %v3199_v54 = vld [vmem:[%s4443_s1 + $0x56c] ss:$16 sps:$4 sm:$0xff]  }
  0x73   :  { %1960 = vmatpush1.bf16.msra.mxu0 %v3098_v55  ;;  %2225 = vmatpush1.bf16.msra.mxu1 %v3101_v56  ;;  %v3194_v55 = vld [vmem:[%s4443_s1 + $0x560] ss:$16 sps:$4 sm:$0xff]   ;;  %v3197_v56 = vld [vmem:[%s4443_s1 + $0x568] ss:$16 sps:$4 sm:$0xff]  }
  0x74   :  { %1961 = vmatprep.subr.bf16.mxu0 %v3106_v57  ;;  %2226 = vmatprep.subr.bf16.mxu1 %v3109_v58  ;;  %v3202_v57 = vld [vmem:[%s4443_s1 + $0x584] ss:$16 sps:$4 sm:$0xff]   ;;  %v3205_v58 = vld [vmem:[%s4443_s1 + $0x58c] ss:$16 sps:$4 sm:$0xff]  }
  0x77   :  { %1962 = vmatpush1.bf16.msra.mxu0 %v3104_v59  ;;  %2227 = vmatpush1.bf16.msra.mxu1 %v3107_v60  ;;  %v3200_v59 = vld [vmem:[%s4443_s1 + $0x580] ss:$16 sps:$4 sm:$0xff]   ;;  %v3203_v60 = vld [vmem:[%s4443_s1 + $0x588] ss:$16 sps:$4 sm:$0xff]  }
  0x78   :  { %1963 = vmatprep.subr.bf16.mxu0 %v3114_v61  ;;  %2228 = vmatprep.subr.bf16.mxu1 %v3117_v62  ;;  %v3208_v61 = vld [vmem:[%s4443_s1 + $0x5a4] ss:$16 sps:$4 sm:$0xff]   ;;  %v3211_v62 = vld [vmem:[%s4443_s1 + $0x5ac] ss:$16 sps:$4 sm:$0xff]  }
  0x7b   :  { %1964 = vmatpush1.bf16.msra.mxu0 %v3112_v63  ;;  %2229 = vmatpush1.bf16.msra.mxu1 %v3115_v0  ;;  %v3206_v63 = vld [vmem:[%s4443_s1 + $0x5a0] ss:$16 sps:$4 sm:$0xff]   ;;  %v3209_v0 = vld [vmem:[%s4443_s1 + $0x5a8] ss:$16 sps:$4 sm:$0xff]  }
  0x7c   :  { %1965 = vmatprep.subr.bf16.mxu0 %v3121_v1  ;;  %2230 = vmatprep.subr.bf16.mxu1 %v3124_v2  ;;  %v3216_v1 = vld [vmem:[%s4443_s1 + $0x5c4] ss:$16 sps:$4 sm:$0xff]   ;;  %v3219_v2 = vld [vmem:[%s4443_s1 + $0x5cc] ss:$16 sps:$4 sm:$0xff]  }
  0x7f   :  { %1966 = vmatpush1.bf16.msra.mxu0 %v3119_v3  ;;  %2231 = vmatpush1.bf16.msra.mxu1 %v3122_v4  ;;  %v3214_v3 = vld [vmem:[%s4443_s1 + $0x5c0] ss:$16 sps:$4 sm:$0xff]   ;;  %v3217_v4 = vld [vmem:[%s4443_s1 + $0x5c8] ss:$16 sps:$4 sm:$0xff]  }
  0x80   :  { %1988 = vmatprep.subr.bf16.mxu0 %v3130_v5  ;;  %2253 = vmatprep.subr.bf16.mxu1 %v3133_v6  ;;  %v3223_v5 = vld [vmem:[%s4443_s1 + $0x5e4] ss:$16 sps:$4 sm:$0xff]   ;;  %v3226_v6 = vld [vmem:[%s4443_s1 + $0x5ec] ss:$16 sps:$4 sm:$0xff]  }
  0x82   :  { %1968 = vmatmul.mubr.bf16.vlgmr.msra.gmra.mrb[0].mxu0 %v3125_v7  ;;  %2233 = vmatmul.mubr.bf16.vlgmr.msra.gmra.mrb[0].mxu1 %v3125_v7  ;;  %v3221_v7 = vld [vmem:[%s4443_s1 + $0x5e0] ss:$16 sps:$4 sm:$0xff]  }
  0x83   :  { %1989 = vmatpush1.bf16.msra.mxu0 %v3128_v8  ;;  %2254 = vmatpush1.bf16.msra.mxu1 %v3131_v9  ;;  %v3224_v8 = vld [vmem:[%s4443_s1 + $0x5e8] ss:$16 sps:$4 sm:$0xff]   ;;  %v3232_v9 = vld [vmem:[%s4443_s1 + $0x604] ss:$16 sps:$4 sm:$0xff]  }
  0x84   :  { %1990 = vmatprep.subr.bf16.mxu0 %v3136_v10  ;;  %2255 = vmatprep.subr.bf16.mxu1 %v3139_v11  ;;  %v3235_v10 = vld [vmem:[%s4443_s1 + $0x60c] ss:$16 sps:$4 sm:$0xff]   ;;  %v3227_v11 = vld [vmem:[%s4444_s0 + $0x10] ss:$36 sps:$4 sm:$0xff]  }
  0x85   :  { %1977 = vmatprep.mubr.bf16.mxu0 %v3212_v12  ;;  %2242 = vmatprep.mubr.bf16.mxu1 %v3212_v12  ;;  %v3230_v12 = vld [vmem:[%s4443_s1 + $0x600] ss:$16 sps:$4 sm:$0xff]  }
  0x87   :  { %1991 = vmatpush1.bf16.msra.mxu0 %v3134_v13  ;;  %2256 = vmatpush1.bf16.msra.mxu1 %v3137_v14  ;;  %v3233_v13 = vld [vmem:[%s4443_s1 + $0x608] ss:$16 sps:$4 sm:$0xff]   ;;  %v3238_v14 = vld [vmem:[%s4443_s1 + $0x624] ss:$16 sps:$4 sm:$0xff]  }
  0x88   :  { %1992 = vmatprep.subr.bf16.mxu0 %v3142_v15  ;;  %2257 = vmatprep.subr.bf16.mxu1 %v3145_v16  ;;  %v3241_v15 = vld [vmem:[%s4443_s1 + $0x62c] ss:$16 sps:$4 sm:$0xff]  }
  0x89   :  { %v3314_v16 = vld [vmem:[%s4444_s0 + $0x5c] ss:$36 sps:$4 sm:$0xff]  }
  0x8a   :  { %1978 = vmatmul.mubr.bf16.gmra.mrb[4].mxu0 %v3220_v19  ;;  %2243 = vmatmul.mubr.bf16.gmra.mrb[4].mxu1 %v3220_v19  ;;  %v3244_v19 = vld [vmem:[%s4443_s1 + $0x644] ss:$16 sps:$4 sm:$0xff]  }
  0x8b   :  { %1993 = vmatpush1.bf16.msra.mxu0 %v3140_v17  ;;  %2258 = vmatpush1.bf16.msra.mxu1 %v3143_v18  ;;  %v3236_v17 = vld [vmem:[%s4443_s1 + $0x620] ss:$16 sps:$4 sm:$0xff]   ;;  %v3239_v18 = vld [vmem:[%s4443_s1 + $0x628] ss:$16 sps:$4 sm:$0xff]  }
  0x8c   :  { %1994 = vmatprep.subr.bf16.mxu0 %v3148_v20  ;;  %2259 = vmatprep.subr.bf16.mxu1 %v3151_v21  ;;  %v3247_v20 = vld [vmem:[%s4443_s1 + $0x64c] ss:$16 sps:$4 sm:$0xff]   ;;  %v3242_v21 = vld [vmem:[%s4443_s1 + $0x640] ss:$16 sps:$4 sm:$0xff]  }
  0x8d   :  { %2020 = vmatprep.mubr.bf16.mxu0 %v3229_v22  ;;  %2285 = vmatprep.mubr.bf16.mxu1 %v3229_v22  ;;  %v3245_v22 = vld [vmem:[%s4443_s1 + $0x648] ss:$16 sps:$4 sm:$0xff]  }
  0x8f   :  { %1995 = vmatpush1.bf16.msra.mxu0 %v3146_v23  ;;  %2260 = vmatpush1.bf16.msra.mxu1 %v3149_v24  ;;  %v3322_v23 = vld [vmem:[%s4444_s0 + $0x58] ss:$36 sps:$4 sm:$0xff]   ;;  %v3250_v24 = vld [vmem:[%s4443_s1 + $0x664] ss:$16 sps:$4 sm:$0xff]  }
  0x90   :  { %1996 = vmatprep.subr.bf16.mxu0 %v3154_v25  ;;  %2261 = vmatprep.subr.bf16.mxu1 %v3157_v26  ;;  %v3253_v25 = vld [vmem:[%s4443_s1 + $0x66c] ss:$16 sps:$4 sm:$0xff]  }
  0x91   :  { %v3331_v26 = vld [vmem:[%s4444_s0 + $0x1c] ss:$36 sps:$4 sm:$0xff]  }
  0x93   :  { %1997 = vmatpush1.bf16.msra.mxu0 %v3152_v27  ;;  %2262 = vmatpush1.bf16.msra.mxu1 %v3155_v28  ;;  %v3248_v27 = vld [vmem:[%s4443_s1 + $0x660] ss:$16 sps:$4 sm:$0xff]   ;;  %v3251_v28 = vld [vmem:[%s4443_s1 + $0x668] ss:$16 sps:$4 sm:$0xff]  }
  0x94   :  { %1998 = vmatprep.subr.bf16.mxu0 %v3160_v29  ;;  %2263 = vmatprep.subr.bf16.mxu1 %v3163_v30  ;;  %v3256_v29 = vld [vmem:[%s4443_s1 + $0x684] ss:$16 sps:$4 sm:$0xff]   ;;  %v3259_v30 = vld [vmem:[%s4443_s1 + $0x68c] ss:$16 sps:$4 sm:$0xff]  }
  0x97   :  { %1999 = vmatpush1.bf16.msra.mxu0 %v3158_v31  ;;  %2264 = vmatpush1.bf16.msra.mxu1 %v3161_v32  ;;  %v3254_v31 = vld [vmem:[%s4443_s1 + $0x680] ss:$16 sps:$4 sm:$0xff]   ;;  %v3257_v32 = vld [vmem:[%s4443_s1 + $0x688] ss:$16 sps:$4 sm:$0xff]  }
  0x98   :  { %2000 = vmatprep.subr.bf16.mxu0 %v3166_v33  ;;  %2265 = vmatprep.subr.bf16.mxu1 %v3169_v34  ;;  %v3262_v33 = vld [vmem:[%s4443_s1 + $0x6a4] ss:$16 sps:$4 sm:$0xff]   ;;  %v3265_v34 = vld [vmem:[%s4443_s1 + $0x6ac] ss:$16 sps:$4 sm:$0xff]  }
  0x9b   :  { %2001 = vmatpush1.bf16.msra.mxu0 %v3164_v35  ;;  %2266 = vmatpush1.bf16.msra.mxu1 %v3167_v36  ;;  %v3260_v35 = vld [vmem:[%s4443_s1 + $0x6a0] ss:$16 sps:$4 sm:$0xff]   ;;  %v3263_v36 = vld [vmem:[%s4443_s1 + $0x6a8] ss:$16 sps:$4 sm:$0xff]  }
  0x9c   :  { %2002 = vmatprep.subr.bf16.mxu0 %v3172_v37  ;;  %2267 = vmatprep.subr.bf16.mxu1 %v3175_v38  ;;  %v3268_v37 = vld [vmem:[%s4443_s1 + $0x6c4] ss:$16 sps:$4 sm:$0xff]   ;;  %v3271_v38 = vld [vmem:[%s4443_s1 + $0x6cc] ss:$16 sps:$4 sm:$0xff]  }
  0x9f   :  { %2003 = vmatpush1.bf16.msra.mxu0 %v3170_v39  ;;  %2268 = vmatpush1.bf16.msra.mxu1 %v3173_v40  ;;  %v3266_v39 = vld [vmem:[%s4443_s1 + $0x6c0] ss:$16 sps:$4 sm:$0xff]   ;;  %v3269_v40 = vld [vmem:[%s4443_s1 + $0x6c8] ss:$16 sps:$4 sm:$0xff]  }
  0xa0   :  { %2004 = vmatprep.subr.bf16.mxu0 %v3178_v41  ;;  %2269 = vmatprep.subr.bf16.mxu1 %v3181_v42  ;;  %v3274_v41 = vld [vmem:[%s4443_s1 + $0x6e4] ss:$16 sps:$4 sm:$0xff]   ;;  %v3277_v42 = vld [vmem:[%s4443_s1 + $0x6ec] ss:$16 sps:$4 sm:$0xff]  }
  0xa3   :  { %2005 = vmatpush1.bf16.msra.mxu0 %v3176_v43  ;;  %2270 = vmatpush1.bf16.msra.mxu1 %v3179_v44  ;;  %v3272_v43 = vld [vmem:[%s4443_s1 + $0x6e0] ss:$16 sps:$4 sm:$0xff]   ;;  %v3275_v44 = vld [vmem:[%s4443_s1 + $0x6e8] ss:$16 sps:$4 sm:$0xff]  }
  0xa4   :  { %2006 = vmatprep.subr.bf16.mxu0 %v3184_v45  ;;  %2271 = vmatprep.subr.bf16.mxu1 %v3187_v46  ;;  %v3280_v45 = vld [vmem:[%s4443_s1 + $0x704] ss:$16 sps:$4 sm:$0xff]   ;;  %v3283_v46 = vld [vmem:[%s4443_s1 + $0x70c] ss:$16 sps:$4 sm:$0xff]  }
  0xa7   :  { %2007 = vmatpush1.bf16.msra.mxu0 %v3182_v47  ;;  %2272 = vmatpush1.bf16.msra.mxu1 %v3185_v48  ;;  %v3278_v47 = vld [vmem:[%s4443_s1 + $0x700] ss:$16 sps:$4 sm:$0xff]   ;;  %v3281_v48 = vld [vmem:[%s4443_s1 + $0x708] ss:$16 sps:$4 sm:$0xff]  }
  0xa8   :  { %2008 = vmatprep.subr.bf16.mxu0 %v3190_v49  ;;  %2273 = vmatprep.subr.bf16.mxu1 %v3193_v50  ;;  %v3286_v49 = vld [vmem:[%s4443_s1 + $0x724] ss:$16 sps:$4 sm:$0xff]   ;;  %v3289_v50 = vld [vmem:[%s4443_s1 + $0x72c] ss:$16 sps:$4 sm:$0xff]  }
  0xab   :  { %2009 = vmatpush1.bf16.msra.mxu0 %v3188_v51  ;;  %2274 = vmatpush1.bf16.msra.mxu1 %v3191_v52  ;;  %v3284_v51 = vld [vmem:[%s4443_s1 + $0x720] ss:$16 sps:$4 sm:$0xff]   ;;  %v3287_v52 = vld [vmem:[%s4443_s1 + $0x728] ss:$16 sps:$4 sm:$0xff]  }
  0xac   :  { %2010 = vmatprep.subr.bf16.mxu0 %v3196_v53  ;;  %2275 = vmatprep.subr.bf16.mxu1 %v3199_v54  ;;  %v3292_v53 = vld [vmem:[%s4443_s1 + $0x744] ss:$16 sps:$4 sm:$0xff]   ;;  %v3295_v54 = vld [vmem:[%s4443_s1 + $0x74c] ss:$16 sps:$4 sm:$0xff]  }
  0xaf   :  { %2011 = vmatpush1.bf16.msra.mxu0 %v3194_v55  ;;  %2276 = vmatpush1.bf16.msra.mxu1 %v3197_v56  ;;  %v3290_v55 = vld [vmem:[%s4443_s1 + $0x740] ss:$16 sps:$4 sm:$0xff]   ;;  %v3293_v56 = vld [vmem:[%s4443_s1 + $0x748] ss:$16 sps:$4 sm:$0xff]  }
  0xb0   :  { %2012 = vmatprep.subr.bf16.mxu0 %v3202_v57  ;;  %2277 = vmatprep.subr.bf16.mxu1 %v3205_v58  ;;  %v3298_v57 = vld [vmem:[%s4443_s1 + $0x764] ss:$16 sps:$4 sm:$0xff]   ;;  %v3301_v58 = vld [vmem:[%s4443_s1 + $0x76c] ss:$16 sps:$4 sm:$0xff]  }
  0xb3   :  { %2013 = vmatpush1.bf16.msra.mxu0 %v3200_v59  ;;  %2278 = vmatpush1.bf16.msra.mxu1 %v3203_v60  ;;  %v3296_v59 = vld [vmem:[%s4443_s1 + $0x760] ss:$16 sps:$4 sm:$0xff]   ;;  %v3299_v60 = vld [vmem:[%s4443_s1 + $0x768] ss:$16 sps:$4 sm:$0xff]  }
  0xb4   :  { %2014 = vmatprep.subr.bf16.mxu0 %v3208_v61  ;;  %2279 = vmatprep.subr.bf16.mxu1 %v3211_v62  ;;  %v3304_v61 = vld [vmem:[%s4443_s1 + $0x784] ss:$16 sps:$4 sm:$0xff]   ;;  %v3307_v62 = vld [vmem:[%s4443_s1 + $0x78c] ss:$16 sps:$4 sm:$0xff]  }
  0xb7   :  { %2015 = vmatpush1.bf16.msra.mxu0 %v3206_v63  ;;  %2280 = vmatpush1.bf16.msra.mxu1 %v3209_v0  ;;  %v3302_v63 = vld [vmem:[%s4443_s1 + $0x780] ss:$16 sps:$4 sm:$0xff]   ;;  %v3305_v0 = vld [vmem:[%s4443_s1 + $0x788] ss:$16 sps:$4 sm:$0xff]  }
  0xb8   :  { %2016 = vmatprep.subr.bf16.mxu0 %v3216_v1  ;;  %2281 = vmatprep.subr.bf16.mxu1 %v3219_v2  ;;  %v3310_v1 = vld [vmem:[%s4443_s1 + $0x7a4] ss:$16 sps:$4 sm:$0xff]   ;;  %v3313_v2 = vld [vmem:[%s4443_s1 + $0x7ac] ss:$16 sps:$4 sm:$0xff]  }
  0xbb   :  { %2017 = vmatpush1.bf16.msra.mxu0 %v3214_v3  ;;  %2282 = vmatpush1.bf16.msra.mxu1 %v3217_v4  ;;  %v3308_v3 = vld [vmem:[%s4443_s1 + $0x7a0] ss:$16 sps:$4 sm:$0xff]   ;;  %v3311_v4 = vld [vmem:[%s4443_s1 + $0x7a8] ss:$16 sps:$4 sm:$0xff]  }
  0xbc   :  { %2018 = vmatprep.subr.bf16.mxu0 %v3223_v5  ;;  %2283 = vmatprep.subr.bf16.mxu1 %v3226_v6  ;;  %v3318_v5 = vld [vmem:[%s4443_s1 + $0x7c4] ss:$16 sps:$4 sm:$0xff]   ;;  %v3321_v6 = vld [vmem:[%s4443_s1 + $0x7cc] ss:$16 sps:$4 sm:$0xff]  }
  0xbf   :  { %2019 = vmatpush1.bf16.msra.mxu0 %v3221_v7  ;;  %2284 = vmatpush1.bf16.msra.mxu1 %v3224_v8  ;;  %v3316_v7 = vld [vmem:[%s4443_s1 + $0x7c0] ss:$16 sps:$4 sm:$0xff]   ;;  %v3319_v8 = vld [vmem:[%s4443_s1 + $0x7c8] ss:$16 sps:$4 sm:$0xff]  }
  0xc0   :  { %2041 = vmatprep.subr.bf16.mxu0 %v3232_v9  ;;  %2306 = vmatprep.subr.bf16.mxu1 %v3235_v10  ;;  %v3325_v9 = vld [vmem:[%s4443_s1 + $0x7e4] ss:$16 sps:$4 sm:$0xff]   ;;  %v3328_v10 = vld [vmem:[%s4443_s1 + $0x7ec] ss:$16 sps:$4 sm:$0xff]  }
  0xc2   :  { %2021 = vmatmul.mubr.bf16.vlgmr.msra.gmra.mrb[0].mxu0 %v3227_v11  ;;  %2286 = vmatmul.mubr.bf16.vlgmr.msra.gmra.mrb[0].mxu1 %v3227_v11  ;;  %v3323_v11 = vld [vmem:[%s4443_s1 + $0x7e0] ss:$16 sps:$4 sm:$0xff]  }
  0xc3   :  { %2042 = vmatpush1.bf16.msra.mxu0 %v3230_v12  ;;  %2307 = vmatpush1.bf16.msra.mxu1 %v3233_v13  ;;  %v3326_v12 = vld [vmem:[%s4443_s1 + $0x7e8] ss:$16 sps:$4 sm:$0xff]   ;;  %v3334_v13 = vld [vmem:[%s4443_s1 + $0x804] ss:$16 sps:$4 sm:$0xff]  }
  0xc4   :  { %2043 = vmatprep.subr.bf16.mxu0 %v3238_v14  ;;  %2308 = vmatprep.subr.bf16.mxu1 %v3241_v15  ;;  %v3337_v14 = vld [vmem:[%s4443_s1 + $0x80c] ss:$16 sps:$4 sm:$0xff]  }
  0xc5   :  { %2030 = vmatprep.mubr.bf16.mxu0 %v3314_v16  ;;  %2295 = vmatprep.mubr.bf16.mxu1 %v3314_v16  ;;  %v3329_v15 = vld [vmem:[%s4444_s0 + $0x18] ss:$36 sps:$4 sm:$0xff]   ;;  %v3332_v16 = vld [vmem:[%s4443_s1 + $0x800] ss:$16 sps:$4 sm:$0xff]  }
  0xc7   :  { %2044 = vmatpush1.bf16.msra.mxu0 %v3236_v17  ;;  %2309 = vmatpush1.bf16.msra.mxu1 %v3239_v18  ;;  %v3335_v17 = vld [vmem:[%s4443_s1 + $0x808] ss:$16 sps:$4 sm:$0xff]   ;;  %v3340_v18 = vld [vmem:[%s4443_s1 + $0x824] ss:$16 sps:$4 sm:$0xff]  }
  0xc8   :  { %2045 = vmatprep.subr.bf16.mxu0 %v3244_v19  ;;  %2310 = vmatprep.subr.bf16.mxu1 %v3247_v20  ;;  %v3343_v19 = vld [vmem:[%s4443_s1 + $0x82c] ss:$16 sps:$4 sm:$0xff]   ;;  %v3368_v20 = vld [vmem:[%s4444_s0 + $0x64] ss:$36 sps:$4 sm:$0xff]  }
  0xca   :  { %2031 = vmatmul.mubr.bf16.gmra.mrb[4].mxu0 %v3322_v23  ;;  %2296 = vmatmul.mubr.bf16.gmra.mrb[4].mxu1 %v3322_v23  ;;  %v3346_v23 = vld [vmem:[%s4443_s1 + $0x844] ss:$16 sps:$4 sm:$0xff]  }
  0xcb   :  { %2046 = vmatpush1.bf16.msra.mxu0 %v3242_v21  ;;  %2311 = vmatpush1.bf16.msra.mxu1 %v3245_v22  ;;  %v3338_v21 = vld [vmem:[%s4443_s1 + $0x820] ss:$16 sps:$4 sm:$0xff]   ;;  %v3341_v22 = vld [vmem:[%s4443_s1 + $0x828] ss:$16 sps:$4 sm:$0xff]  }
  0xcc   :  { %2047 = vmatprep.subr.bf16.mxu0 %v3250_v24  ;;  %2312 = vmatprep.subr.bf16.mxu1 %v3253_v25  ;;  %v3349_v24 = vld [vmem:[%s4443_s1 + $0x84c] ss:$16 sps:$4 sm:$0xff]   ;;  %v3370_v25 = vld [vmem:[%s4444_s0 + $0x60] ss:$36 sps:$4 sm:$0xff]  }
  0xcd   :  { %2073 = vmatprep.mubr.bf16.mxu0 %v3331_v26  ;;  %2338 = vmatprep.mubr.bf16.mxu1 %v3331_v26  ;;  %v3344_v26 = vld [vmem:[%s4443_s1 + $0x840] ss:$16 sps:$4 sm:$0xff]  }
  0xcf   :  { %2048 = vmatpush1.bf16.msra.mxu0 %v3248_v27  ;;  %2313 = vmatpush1.bf16.msra.mxu1 %v3251_v28  ;;  %v3347_v27 = vld [vmem:[%s4443_s1 + $0x848] ss:$16 sps:$4 sm:$0xff]   ;;  %v3352_v28 = vld [vmem:[%s4443_s1 + $0x864] ss:$16 sps:$4 sm:$0xff]  }
  0xd0   :  { %2049 = vmatprep.subr.bf16.mxu0 %v3256_v29  ;;  %2314 = vmatprep.subr.bf16.mxu1 %v3259_v30  ;;  %v3355_v29 = vld [vmem:[%s4443_s1 + $0x86c] ss:$16 sps:$4 sm:$0xff]   ;;  %v3350_v30 = vld [vmem:[%s4443_s1 + $0x860] ss:$16 sps:$4 sm:$0xff]  }
  0xd3   :  { %2050 = vmatpush1.bf16.msra.mxu0 %v3254_v31  ;;  %2315 = vmatpush1.bf16.msra.mxu1 %v3257_v32  ;;  %v3353_v31 = vld [vmem:[%s4443_s1 + $0x868] ss:$16 sps:$4 sm:$0xff]   ;;  %v3358_v32 = vld [vmem:[%s4443_s1 + $0x884] ss:$16 sps:$4 sm:$0xff]  }
  0xd4   :  { %2051 = vmatprep.subr.bf16.mxu0 %v3262_v33  ;;  %2316 = vmatprep.subr.bf16.mxu1 %v3265_v34  ;;  %v3361_v33 = vld [vmem:[%s4443_s1 + $0x88c] ss:$16 sps:$4 sm:$0xff]   ;;  %v3449_v34 = vmov 0  }
  0xd7   :  { %2052 = vmatpush1.bf16.msra.mxu0 %v3260_v35  ;;  %2317 = vmatpush1.bf16.msra.mxu1 %v3263_v36  ;;  %v3356_v35 = vld [vmem:[%s4443_s1 + $0x880] ss:$16 sps:$4 sm:$0xff]   ;;  %v3359_v36 = vld [vmem:[%s4443_s1 + $0x888] ss:$16 sps:$4 sm:$0xff]  }
  0xd8   :  { %2053 = vmatprep.subr.bf16.mxu0 %v3268_v37  ;;  %2318 = vmatprep.subr.bf16.mxu1 %v3271_v38  ;;  %v3364_v37 = vld [vmem:[%s4443_s1 + $0x8a4] ss:$16 sps:$4 sm:$0xff]   ;;  %v3367_v38 = vld [vmem:[%s4443_s1 + $0x8ac] ss:$16 sps:$4 sm:$0xff]  }
  0xdb   :  { %2054 = vmatpush1.bf16.msra.mxu0 %v3266_v39  ;;  %2319 = vmatpush1.bf16.msra.mxu1 %v3269_v40  ;;  %v3362_v39 = vld [vmem:[%s4443_s1 + $0x8a0] ss:$16 sps:$4 sm:$0xff]   ;;  %v3365_v40 = vld [vmem:[%s4443_s1 + $0x8a8] ss:$16 sps:$4 sm:$0xff]  }
  0xdc   :  { %2055 = vmatprep.subr.bf16.mxu0 %v3274_v41  ;;  %2320 = vmatprep.subr.bf16.mxu1 %v3277_v42  ;;  %v3373_v41 = vld [vmem:[%s4443_s1 + $0x8c4] ss:$16 sps:$4 sm:$0xff]   ;;  %v3376_v42 = vld [vmem:[%s4443_s1 + $0x8cc] ss:$16 sps:$4 sm:$0xff]  }
  0xdf   :  { %2056 = vmatpush1.bf16.msra.mxu0 %v3272_v43  ;;  %2321 = vmatpush1.bf16.msra.mxu1 %v3275_v44  ;;  %v3371_v43 = vld [vmem:[%s4443_s1 + $0x8c0] ss:$16 sps:$4 sm:$0xff]   ;;  %v3374_v44 = vld [vmem:[%s4443_s1 + $0x8c8] ss:$16 sps:$4 sm:$0xff]  }
  0xe0   :  { %2057 = vmatprep.subr.bf16.mxu0 %v3280_v45  ;;  %2322 = vmatprep.subr.bf16.mxu1 %v3283_v46  ;;  %v3379_v45 = vld [vmem:[%s4443_s1 + $0x8e4] ss:$16 sps:$4 sm:$0xff]   ;;  %v3382_v46 = vld [vmem:[%s4443_s1 + $0x8ec] ss:$16 sps:$4 sm:$0xff]  }
  0xe3   :  { %2058 = vmatpush1.bf16.msra.mxu0 %v3278_v47  ;;  %2323 = vmatpush1.bf16.msra.mxu1 %v3281_v48  ;;  %v3377_v47 = vld [vmem:[%s4443_s1 + $0x8e0] ss:$16 sps:$4 sm:$0xff]   ;;  %v3380_v48 = vld [vmem:[%s4443_s1 + $0x8e8] ss:$16 sps:$4 sm:$0xff]  }
  0xe4   :  { %2059 = vmatprep.subr.bf16.mxu0 %v3286_v49  ;;  %2324 = vmatprep.subr.bf16.mxu1 %v3289_v50  ;;  %v3383_v49 = vld [vmem:[%s4444_s0 + $0x20] ss:$36 sps:$4 sm:$0xff]   ;;  %v3384_v50 = vld [vmem:[%s4444_s0 + $0x68] ss:$36 sps:$4 sm:$0xff]  }
  0xe7   :  { %2060 = vmatpush1.bf16.msra.mxu0 %v3284_v51  ;;  %2325 = vmatpush1.bf16.msra.mxu1 %v3287_v52  ;;  %v330_v51 = vlaneseq }
  0xe8   :  { %2061 = vmatprep.subr.bf16.mxu0 %v3292_v53  ;;  %2326 = vmatprep.subr.bf16.mxu1 %v3295_v54  ;;  %v328_v54 = vld [vmem:[%s4445_s2] sm:$0xf] }
  0xe9   :  { %v331_v52 = vshrl.u32 %v330_v51, 7 }
  0xeb   :  { %2062 = vmatpush1.bf16.msra.mxu0 %v3290_v55  ;;  %2327 = vmatpush1.bf16.msra.mxu1 %v3293_v56  ;;  %v332_v53 = vsub.s32 0, %v331_v52  ;;  %v336_v55 = vsub.s32 1, %v331_v52 }
  0xec   :  { %2063 = vmatprep.subr.bf16.mxu0 %v3298_v57  ;;  %2328 = vmatprep.subr.bf16.mxu1 %v3301_v58  ;;  %v340_v57 = vsub.s32 2, %v331_v52 }
  0xed   :  { %v333_v56 = vrot.slane %v328_v54, %v332_v53  ;;  %v337_v58 = vrot.slane %v328_v54, %v336_v55 }
  0xef   :  { %2064 = vmatpush1.bf16.msra.mxu0 %v3296_v59  ;;  %2329 = vmatpush1.bf16.msra.mxu1 %v3299_v60 }
  0xf0   :  { %2065 = vmatprep.subr.bf16.mxu0 %v3304_v61  ;;  %2330 = vmatprep.subr.bf16.mxu1 %v3307_v62  ;;  %v344_v61 = vsub.s32 3, %v331_v52 }
  0xf3   :  { %2066 = vmatpush1.bf16.msra.mxu0 %v3302_v63  ;;  %2331 = vmatpush1.bf16.msra.mxu1 %v3305_v0 }
  0xf4   :  { %2067 = vmatprep.subr.bf16.mxu0 %v3310_v1  ;;  %2332 = vmatprep.subr.bf16.mxu1 %v3313_v2  ;;  %v4401_v1 = vrot.slane %v328_v54, %v340_v57 }
  0xf7   :  { %2068 = vmatpush1.bf16.msra.mxu0 %v3308_v3  ;;  %2333 = vmatpush1.bf16.msra.mxu1 %v3311_v4 }
  0xf8   :  { %2069 = vmatprep.subr.bf16.mxu0 %v3318_v5  ;;  %2334 = vmatprep.subr.bf16.mxu1 %v3321_v6 }
  0xfb   :  { %2070 = vmatpush1.bf16.msra.mxu0 %v3316_v7  ;;  %2335 = vmatpush1.bf16.msra.mxu1 %v3319_v8 }
  0xfc   :  { %2071 = vmatprep.subr.bf16.mxu0 %v3325_v9  ;;  %2336 = vmatprep.subr.bf16.mxu1 %v3328_v10  ;;  %v345_v10 = vrot.slane %v328_v54, %v344_v61 }
  0xff   :  { %2072 = vmatpush1.bf16.msra.mxu0 %v3323_v11  ;;  %2337 = vmatpush1.bf16.msra.mxu1 %v3326_v12 }
 0x100   :  { %2094 = vmatprep.subr.bf16.mxu0 %v3334_v13  ;;  %2359 = vmatprep.subr.bf16.mxu1 %v3337_v14 }
 0x102   :  { %2074 = vmatmul.mubr.bf16.vlgmr.msra.gmra.mrb[0].mxu0 %v3329_v15  ;;  %2339 = vmatmul.mubr.bf16.vlgmr.msra.gmra.mrb[0].mxu1 %v3329_v15 }
 0x103   :  { %2095 = vmatpush1.bf16.msra.mxu0 %v3332_v16  ;;  %2360 = vmatpush1.bf16.msra.mxu1 %v3335_v17 }
 0x104   :  { %2096 = vmatprep.subr.bf16.mxu0 %v3340_v18  ;;  %2361 = vmatprep.subr.bf16.mxu1 %v3343_v19 }
 0x105   :  { %2083 = vmatprep.mubr.bf16.mxu0 %v3368_v20  ;;  %2348 = vmatprep.mubr.bf16.mxu1 %v3368_v20 }
 0x107   :  { %2097 = vmatpush1.bf16.msra.mxu0 %v3338_v21  ;;  %2362 = vmatpush1.bf16.msra.mxu1 %v3341_v22 }
 0x108   :  { %2098 = vmatprep.subr.bf16.mxu0 %v3346_v23  ;;  %2363 = vmatprep.subr.bf16.mxu1 %v3349_v24 }
 0x10a   :  { %2084 = vmatmul.mubr.bf16.gmra.mrb[4].mxu0 %v3370_v25  ;;  %2349 = vmatmul.mubr.bf16.gmra.mrb[4].mxu1 %v3370_v25 }
 0x10b   :  { %2099 = vmatpush1.bf16.msra.mxu0 %v3344_v26  ;;  %2364 = vmatpush1.bf16.msra.mxu1 %v3347_v27 }
 0x10c   :  { %2100 = vmatprep.subr.bf16.mxu0 %v3352_v28  ;;  %2365 = vmatprep.subr.bf16.mxu1 %v3355_v29 }
 0x10d   :  { %2126 = vmatprep.mubr.bf16.mxu0 %v3449_v34  ;;  %2391 = vmatprep.mubr.bf16.mxu1 %v3449_v34 }
 0x10f   :  { %2101 = vmatpush1.bf16.msra.mxu0 %v3350_v30  ;;  %2366 = vmatpush1.bf16.msra.mxu1 %v3353_v31 }
 0x110   :  { %2102 = vmatprep.subr.bf16.mxu0 %v3358_v32  ;;  %2367 = vmatprep.subr.bf16.mxu1 %v3361_v33 }
 0x113   :  { %2103 = vmatpush1.bf16.msra.mxu0 %v3356_v35  ;;  %2368 = vmatpush1.bf16.msra.mxu1 %v3359_v36 }
 0x114   :  { %2104 = vmatprep.subr.bf16.mxu0 %v3364_v37  ;;  %2369 = vmatprep.subr.bf16.mxu1 %v3367_v38 }
 0x117   :  { %2105 = vmatpush1.bf16.msra.mxu0 %v3362_v39  ;;  %2370 = vmatpush1.bf16.msra.mxu1 %v3365_v40 }
 0x118   :  { %2106 = vmatprep.subr.bf16.mxu0 %v3373_v41  ;;  %2371 = vmatprep.subr.bf16.mxu1 %v3376_v42 }
 0x11b   :  { %2107 = vmatpush1.bf16.msra.mxu0 %v3371_v43  ;;  %2372 = vmatpush1.bf16.msra.mxu1 %v3374_v44 }
 0x11c   :  { %2108 = vmatprep.subr.bf16.mxu0 %v3379_v45  ;;  %2373 = vmatprep.subr.bf16.mxu1 %v3382_v46 }
 0x11f   :  { %2109 = vmatpush1.bf16.msra.mxu0 %v3377_v47  ;;  %2374 = vmatpush1.bf16.msra.mxu1 %v3380_v48 }
 0x122   :  { %2127 = vmatmul.mubr.bf16.vlgmr.msra.gmra.mrb[0].mxu0 %v3383_v49  ;;  %2392 = vmatmul.mubr.bf16.vlgmr.msra.gmra.mrb[0].mxu1 %v3383_v49 }
 0x123   :  { %2136 = vmatprep.mubr.bf16.mxu0 %v3449_v34  ;;  %2401 = vmatprep.mubr.bf16.mxu1 %v3449_v34 }
 0x12a   :  { %2137 = vmatmul.mubr.bf16.gmra.mrb[4].mxu0 %v3384_v50  ;;  %2402 = vmatmul.mubr.bf16.gmra.mrb[4].mxu1 %v3384_v50 }
 0x1f5   :  { %v2128_v59 = vpop.f32.mrb[0].mxu0  ;;  %v2393_v60 = vpop.f32.mrb[0].mxu1 }
 0x1f6   :  { %v2846_v62 = vadd.f32 %v2128_v59, %v333_v56  ;;  %v2130_v63 = vpop.f32.mrb[1].mxu0  ;;  %v2395_v0 = vpop.f32.mrb[1].mxu1  ;;  %v2854_v13 = vadd.f32 %v2393_v60, %v4401_v1  ;;  %v2488_v59 = vld [vmem:[%s4446_s3] sm:$0xff] }
 0x1f7   :  { %v2847_v2 = vadd.f32 %v2130_v63, %v337_v58  ;;  %v2132_v3 = vpop.f32.mrb[2].mxu0  ;;  %v2397_v4 = vpop.f32.mrb[2].mxu1  ;;  %v2855_v15 = vadd.f32 %v2395_v0, %v345_v10 }
 0x1f8   :  { %v2834_v5 = vmul.f32 -1.442695, %v2846_v62  ;;  %v2848_v6 = vadd.f32 %v2132_v3, %v333_v56  ;;  %v2134_v7 = vpop.f32.mrb[3].mxu0  ;;  %v2399_v8 = vpop.f32.mrb[3].mxu1  ;;  %v2856_v18 = vadd.f32 %v2397_v4, %v4401_v1  ;;  %v2836_v22 = vmul.f32 -1.442695, %v2854_v13 }
 0x1f9   :  { %v2835_v9 = vmul.f32 -1.442695, %v2847_v2  ;;  %v2849_v11 = vadd.f32 %v2134_v7, %v337_v58  ;;  %v2857_v34 = vadd.f32 %v2399_v8, %v345_v10  ;;  %v2489_v3 = vld [vmem:[%s4446_s3 + $0x8] sm:$0xff] }
 0x1fa   :  { %3385 = vpow2.f32 %v2834_v5  ;;  %v2837_v12 = vmul.f32 -1.442695, %v2848_v6  ;;  %v2839_v31 = vmul.f32 -1.442695, %v2856_v18 }
 0x1fb   :  { %v2838_v14 = vmul.f32 -1.442695, %v2849_v11  ;;  %3387 = vpow2.f32 %v2835_v9 }
 0x1fc   :  { %3389 = vpow2.f32 %v2837_v12 }
 0x1fd   :  { %v2138_v16 = vpop.f32.mrb[4].mxu0  ;;  %v2403_v17 = vpop.f32.mrb[4].mxu1  ;;  %3391 = vpow2.f32 %v2838_v14 }
 0x1fe   :  { %v2850_v19 = vadd.f32 %v2138_v16, %v333_v56  ;;  %v2140_v20 = vpop.f32.mrb[5].mxu0  ;;  %v2405_v21 = vpop.f32.mrb[5].mxu1  ;;  %3393 = vtanh.f32 %v2855_v15  ;;  %v2858_v38 = vadd.f32 %v2403_v17, %v4401_v1  ;;  %v2490_v15 = vld [vmem:[%s4446_s3 + $0x10] sm:$0xff] }
 0x1ff   :  { %v2851_v23 = vadd.f32 %v2140_v20, %v337_v58  ;;  %v2142_v24 = vpop.f32.mrb[6].mxu0  ;;  %v2407_v25 = vpop.f32.mrb[6].mxu1  ;;  %v2859_v41 = vadd.f32 %v2405_v21, %v345_v10 }
 0x200   :  { %v2840_v26 = vmul.f32 -1.442695, %v2850_v19  ;;  %v2852_v27 = vadd.f32 %v2142_v24, %v333_v56  ;;  %v2144_v28 = vpop.f32.mrb[7].mxu0  ;;  %v2409_v29 = vpop.f32.mrb[7].mxu1  ;;  %v2842_v46 = vmul.f32 -1.442695, %v2858_v38  ;;  %v2860_v53 = vadd.f32 %v2407_v25, %v4401_v1 }
 0x201   :  { %v2841_v30 = vmul.f32 -1.442695, %v2851_v23  ;;  %v2853_v36 = vadd.f32 %v2144_v28, %v337_v58  ;;  %v2861_v49 = vadd.f32 %v2409_v29, %v345_v10 }
 0x202   :  { %3395 = vpow2.f32 %v2840_v26  ;;  %v2843_v32 = vmul.f32 -1.442695, %v2852_v27  ;;  %v2845_v62 = vmul.f32 -1.442695, %v2860_v53  ;;  %v2491_v27 = vld [vmem:[%s4446_s3 + $0x18] sm:$0xff] }
 0x203   :  { %3397 = vpow2.f32 %v2836_v22  ;;  %v2844_v44 = vmul.f32 -1.442695, %v2853_v36 }
 0x204   :  { %v3386_v33 = vpop.eup %3385  ;;  %3399 = vpow2.f32 %v2841_v30 }
 0x205   :  { %v2448_v35 = vadd.f32 1.0, %v3386_v33  ;;  %3401 = vpow2.f32 %v2843_v32  ;;  %v3388_v37 = vpop.eup %3387 }
 0x206   :  { %3403 = vpow2.f32 %v2839_v31  ;;  %v3390_v39 = vpop.eup %3389  ;;  %v2449_v40 = vadd.f32 1.0, %v3388_v37 }
 0x207   :  { %3405 = vrcp.f32 %v2448_v35  ;;  %v2451_v42 = vadd.f32 1.0, %v3390_v39  ;;  %v3392_v43 = vpop.eup %3391 }
 0x208   :  { %3407 = vtanh.f32 %v2857_v34  ;;  %v2452_v45 = vadd.f32 1.0, %v3392_v43  ;;  %v3394_v47 = vpop.eup %3393 }
 0x209   :  { %3409 = vrcp.f32 %v2449_v40 }
 0x20a   :  { %3411 = vrcp.f32 %v2451_v42 }
 0x20b   :  { %3413 = vtanh.f32 %v2859_v41 }
 0x20c   :  { %v3396_v48 = vpop.eup %3395  ;;  %3415 = vrcp.f32 %v2452_v45 }
 0x20d   :  { %v3398_v50 = vpop.eup %3397  ;;  %v2454_v51 = vadd.f32 1.0, %v3396_v48  ;;  %3417 = vpow2.f32 %v2844_v44 }
 0x20e   :  { %v3400_v52 = vpop.eup %3399  ;;  %3419 = vpow2.f32 %v2842_v46  ;;  %v2450_v0 = vadd.f32 1.0, %v3398_v50 }
 0x20f   :  { %v3402_v54 = vpop.eup %3401  ;;  %3421 = vrcp.f32 %v2454_v51  ;;  %v2455_v55 = vadd.f32 1.0, %v3400_v52 }
 0x210   :  { %v3404_v56 = vpop.eup %3403  ;;  %v2457_v57 = vadd.f32 1.0, %v3402_v54  ;;  %3423 = vtanh.f32 %v2861_v49 }
 0x211   :  { %v3406_v58 = vpop.eup %3405  ;;  %3425 = vrcp.f32 %v2455_v55  ;;  %v2453_v5 = vadd.f32 1.0, %v3404_v56 }
 0x212   :  { %v3408_v60 = vpop.eup %3407  ;;  %v2496_v61 = vmul.f32 %v3406_v58, %v3394_v47  ;;  %3427 = vrcp.f32 %v2457_v57 }
 0x213   :  { %v3410_v63 = vpop.eup %3409  ;;  %3429 = vpow2.f32 %v2845_v62 }
 0x214   :  { %v3412_v2 = vpop.eup %3411  ;;  %v2492_v1 = vmul.f32 %v3410_v63, %v2488_v59  ;;  %3431 = vrcp.f32 %v2450_v0 }
 0x215   :  { %v3414_v4 = vpop.eup %3413  ;;  %v2497_v6 = vmul.f32 %v3412_v2, %v3408_v60 }
 0x216   :  { %v3416_v7 = vpop.eup %3415  ;;  %v2500_v8 = vadd.f32 %v2496_v61, %v2492_v1 }
 0x217   :  { %v3418_v9 = vpop.eup %3417  ;;  %v2493_v10 = vmul.f32 %v3416_v7, %v2489_v3 }
 0x218   :  { %v3420_v11 = vpop.eup %3419  ;;  %3433 = vtanh.f32 %v2500_v8  ;;  %2516 = vst [vmem:[%s4447_s5] sm:$0xff] %v2500_v8  ;;  %v2458_v12 = vadd.f32 1.0, %v3418_v9 }
 0x219   :  { %v3422_v13 = vpop.eup %3421  ;;  %3435 = vrcp.f32 %v2453_v5  ;;  %v2501_v14 = vadd.f32 %v2497_v6, %v2493_v10  ;;  %v2456_v19 = vadd.f32 1.0, %v3420_v11 }
 0x21a   :  { %v3424_v16 = vpop.eup %3423  ;;  %v2498_v17 = vmul.f32 %v3422_v13, %v3414_v4  ;;  %3437 = vrcp.f32 %v2458_v12 }
 0x21b   :  { %v3426_v18 = vpop.eup %3425  ;;  %3439 = vtanh.f32 %v2501_v14  ;;  %2517 = vst [vmem:[%s4447_s5 + $0x8] sm:$0xff] %v2501_v14 }
 0x21c   :  { %v3428_v20 = vpop.eup %3427  ;;  %v2494_v21 = vmul.f32 %v3426_v18, %v2490_v15  ;;  %3441 = vrcp.f32 %v2456_v19 }
 0x21d   :  { %v2499_v22 = vmul.f32 %v3428_v20, %v3424_v16  ;;  %v3430_v24 = vpop.eup %3429 }
 0x21e   :  { %v2502_v23 = vadd.f32 %v2498_v17, %v2494_v21  ;;  %v3432_v25 = vpop.eup %3431  ;;  %v2459_v31 = vadd.f32 1.0, %v3430_v24 }
 0x220   :  { %3443 = vtanh.f32 %v2502_v23  ;;  %2518 = vst [vmem:[%s4447_s5 + $0x10] sm:$0xff] %v2502_v23 }
 0x221   :  { %3445 = vrcp.f32 %v2459_v31 }
 0x222   :  { %v3434_v26 = vpop.eup %3433 }
 0x223   :  { %v3436_v28 = vpop.eup %3435  ;;  %v2508_v29 = vmul.f32 %v3434_v26, %v3432_v25 }
 0x224   :  { %v3438_v30 = vpop.eup %3437 }
 0x225   :  { %v3440_v32 = vpop.eup %3439  ;;  %2512 = vst [vmem:[%s4448_s4] sm:$0xff] %v2508_v29  ;;  %v2495_v33 = vmul.f32 %v3438_v30, %v2491_v27 }
 0x226   :  { %v2509_v34 = vmul.f32 %v3440_v32, %v3436_v28  ;;  %v3442_v36 = vpop.eup %3441 }
 0x227   :  { %v2503_v35 = vadd.f32 %v2499_v22, %v2495_v33 }
 0x228   :  { %2513 = vst [vmem:[%s4448_s4 + $0x8] sm:$0xff] %v2509_v34 }
 0x229   :  { %3447 = vtanh.f32 %v2503_v35  ;;  %2519 = vst [vmem:[%s4447_s5 + $0x18] sm:$0xff] %v2503_v35 }
 0x22a   :  { %v3444_v37 = vpop.eup %3443 }
 0x22b   :  { %v2510_v38 = vmul.f32 %v3444_v37, %v3442_v36  ;;  %v3446_v39 = vpop.eup %3445 }
 0x22d   :  { %2514 = vst [vmem:[%s4448_s4 + $0x10] sm:$0xff] %v2510_v38 }
 0x233   :  { %v3448_v40 = vpop.eup %3447 }
 0x234   :  { %v2511_v41 = vmul.f32 %v3448_v40, %v3446_v39 }
 0x236   :  { %2515 = vst [vmem:[%s4448_s4 + $0x18] sm:$0xff] %v2511_v41 }

</bundles_post_ra>
